<compile_context>
chip_gen: v7x
topology: tpu7x:2x2x1
jax: 0.10.0
libtpu: 0.0.40
codegen_flags: <defaults>
</compile_context>

<pallas_src>
import jax
import jax.numpy as jnp
from jax.experimental import pallas as pl
from jax.experimental.pallas import tpu as pltpu

EPS = 1e-5


def make_resblock_kernel(C, L, conv_dtype):
    def kernel(x_ref, w1_ref, w2_ref, p_ref, st_ref, gm_ref, o_ref):
        BtL = x_ref.shape[1]

        # Per-sample boundary masks for the k=3 'same' conv (only (1, BtL) of
        # cheap iota work per step; everything else constant is a resident input).
        lane = jax.lax.broadcasted_iota(jnp.int32, (1, BtL), 1)
        pos = lane % L
        seg_start = pos == 0
        seg_end = pos == (L - 1)

        # Packed per-channel params: columns [b1, g1, be1, b2, g2, be2, 0, 0]
        b1, g1, be1 = p_ref[:, 0:1], p_ref[:, 1:2], p_ref[:, 2:3]
        b2, g2, be2 = p_ref[:, 3:4], p_ref[:, 4:5], p_ref[:, 5:6]

        ST = st_ref[...]      # (Btp, BtL) f32 segment one-hot (rows >= Bt are zero)
        G2 = gm_ref[...]      # (2C, 2C) f32 block-diag group mask, pre-scaled by 1/(gsz*L)

        def conv1d_k3(h, w_ref, bias):
            # Shifted copies via XLU roll; zero lanes that would leak across
            # batch-segment boundaries (per-sample zero padding).
            h_prev = jnp.where(seg_start, 0.0, pltpu.roll(h, 1, 1))
            h_next = jnp.where(seg_end, 0.0, pltpu.roll(h, BtL - 1, 1))
            # Build hs directly in conv_dtype (halves the 3x activation copy in bf16).
            hs = jnp.concatenate(
                [h_prev.astype(conv_dtype), h.astype(conv_dtype),
                 h_next.astype(conv_dtype)], axis=0)                 # (3C, BtL)
            y = jnp.dot(w_ref[...], hs, preferred_element_type=jnp.float32)
            return y + bias

        def group_norm(h, gamma, beta):
            # One fused stats matmul: [h ; h*h] contracted with ST over lanes.
            hh = jnp.concatenate([h, h * h], axis=0)                 # (2C, BtL)
            stats = jax.lax.dot_general(
                hh, ST, (((1,), (1,)), ((), ())),
                preferred_element_type=jnp.float32)                  # (2C, Btp)
            # One fused group reduction (G2 already carries the 1/count scale).
            gstats = jnp.dot(G2, stats, preferred_element_type=jnp.float32)
            mean = gstats[:C]                                        # (C, Btp)
            # Single-pass variance (E[x^2]-mean^2); f32, activation-scale data.
            var = gstats[C:] - mean * mean
            inv = jax.lax.rsqrt(var + EPS)
            a = inv * gamma                                          # (C, Btp)
            b = beta - mean * a
            # One fused broadcast-back matmul.
            ab = jnp.concatenate([a, b], axis=0)                     # (2C, Btp)
            ab_full = jnp.dot(ab, ST, preferred_element_type=jnp.float32)  # (2C, BtL)
            return h * ab_full[:C] + ab_full[C:]

        h = conv1d_k3(x_ref[...], w1_ref, b1)
        h = group_norm(h, g1, be1)
        h = jnp.maximum(h, 0.0)
        h = conv1d_k3(h, w2_ref, b2)
        h = group_norm(h, g2, be2)
        # Re-read the (resident) input block for the residual add rather than
        # keeping x live across both convs/GNs (shorter live range at big tiles).
        o_ref[...] = jnp.maximum(h + x_ref[...], 0.0)

    return kernel


def _pick_bt(B, L, max_lanes=16384):
    """Largest bt dividing B with bt*L % 128 == 0 and bt*L <= max_lanes,
    preferring >= 2 grid steps so both v7x TensorCores get work."""
    best = None
    for bt in range(B, 0, -1):
        if B % bt or (bt * L) % 128 or bt * L > max_lanes:
            continue
        if best is None:
            best = bt
        if B // bt >= 2:
            return bt
    return best if best is not None else B


def resblock_forward(x, params, *, bt=None, conv_dtype=jnp.bfloat16):
    """x: (B, C, L) float32. params: dict of conv / groupnorm parameters."""
    B, C, L = x.shape
    assert C % 8 == 0, "GroupNorm(chan // 8, chan) requires C % 8 == 0"
    gsz = 8                                    # channels per group
    if bt is None:
        bt = _pick_bt(B, L)
    assert B % bt == 0, "bt must divide B"
    BtL = bt * L
    assert BtL % 128 == 0, (
        "bt*L must be a multiple of 128: the layout relies on lane-dense "
        "(unmasked) stores and (8,128)-aligned BlockSpecs")

    def stack_w(w):  # (Cout, Cin, 3) -> (Cout, 3*Cin), tap order [prev, mid, next]
        return jnp.concatenate([w[:, :, 0], w[:, :, 1], w[:, :, 2]], axis=1)

    w1 = stack_w(params["conv1_w"]).astype(conv_dtype)
    w2 = stack_w(params["conv2_w"]).astype(conv_dtype)
    zero = jnp.zeros((C,), jnp.float32)
    p = jnp.stack(
        [params["conv1_b"], params["gn1_w"], params["gn1_b"],
         params["conv2_b"], params["gn2_w"], params["gn2_b"], zero, zero],
        axis=1,
    ).astype(jnp.float32)                                   # (C, 8)

    # ---- resident GroupNorm constants (one DMA, never rebuilt per step) ----
    # Segment one-hot ST (Btp, BtL); rows are padded up to a multiple of 8
    # sublanes (extra rows are all-zero and provably inert).
    btp = ((bt + 7) // 8) * 8
    bj = jnp.arange(btp)[:, None]
    lj = jnp.arange(BtL)[None, :] // L
    ST = (bj == lj).astype(jnp.float32)                     # (Btp, BtL)
    # Block-diagonal group-membership matrix, pre-scaled by 1/(gsz*L) so the
    # fused dot directly yields [mean ; E[x^2]].
    ci = jnp.arange(C) // gsz
    gmask = (ci[:, None] == ci[None, :]).astype(jnp.float32)
    G2 = jnp.kron(jnp.eye(2, dtype=jnp.float32), gmask) * (1.0 / (gsz * L))

    # Fold batch into the lane axis: (B, C, L) -> (C, B*L)
    x_f = jnp.transpose(x, (1, 0, 2)).reshape(C, B * L).astype(jnp.float32)

    # ---- VMEM budget (only raise the scoped limit when actually needed) ----
    slab_f32 = C * BtL * 4
    conv_bytes = jnp.dtype(conv_dtype).itemsize
    est = 4 * slab_f32                       # in/out blocks, double-buffered
    est += 7 * slab_f32 + 3 * C * BtL * conv_bytes   # live body temporaries (hs is 3 slabs)
    vmem_limit = None
    if est > 30 * (1 << 20):
        # NB: v7x physical VMEM is 64 MiB (vs 128 MiB on v5e/v6e) -- keep BtL
        # <= ~16K lanes there (the default _pick_bt cap enforces this).
        vmem_limit = min(int(est * 1.25), 100 * (1 << 20))

    out_f = pl.pallas_call(
        make_resblock_kernel(C, L, conv_dtype),
        out_shape=jax.ShapeDtypeStruct((C, B * L), jnp.float32),
        grid_spec=pltpu.PrefetchScalarGridSpec(
            num_scalar_prefetch=0,
            grid=(B // bt,),
            in_specs=[
                pl.BlockSpec((C, BtL), lambda i: (0, i)),        # activations
                pl.BlockSpec((C, 3 * C), lambda i: (0, 0)),      # conv1 weights (stacked)
                pl.BlockSpec((C, 3 * C), lambda i: (0, 0)),      # conv2 weights (stacked)
                pl.BlockSpec((C, 8), lambda i: (0, 0)),          # packed per-channel params
                pl.BlockSpec((btp, BtL), lambda i: (0, 0)),      # segment one-hot ST
                pl.BlockSpec((2 * C, 2 * C), lambda i: (0, 0)),  # scaled group mask G2
            ],
            out_specs=pl.BlockSpec((C, BtL), lambda i: (0, i)),
        ),
        compiler_params=pltpu.CompilerParams(
            dimension_semantics=("parallel",),
            vmem_limit_bytes=vmem_limit),
    )(x_f, w1, w2, p, ST, G2)

    return out_f.reshape(C, B, L).transpose(1, 0, 2)


# ---------------- pure-JAX reference (for correctness check) -----------------
def _ref_conv1d_k3(x, w, b):  # x (C,L), w (Cout,Cin,3), b (C,)
    L = x.shape[1]
    xp = jnp.pad(x, ((0, 0), (1, 1)))
    y = (jnp.dot(w[:, :, 0], xp[:, 0:L])
         + jnp.dot(w[:, :, 1], xp[:, 1:L + 1])
         + jnp.dot(w[:, :, 2], xp[:, 2:L + 2]))
    return y + b[:, None]


def _ref_group_norm(x, gamma, beta, G):
    C, L = x.shape
    xg = x.reshape(G, -1)
    mean = xg.mean(-1, keepdims=True)
    var = ((xg - mean) ** 2).mean(-1, keepdims=True)
    xn = ((xg - mean) / jnp.sqrt(var + EPS)).reshape(C, L)
    return xn * gamma[:, None] + beta[:, None]


def resblock_reference(x, p):
    G = x.shape[1] // 8

    def one(xi):
        h = _ref_conv1d_k3(xi, p["conv1_w"], p["conv1_b"])
        h = _ref_group_norm(h, p["gn1_w"], p["gn1_b"], G)
        h = jnp.maximum(h, 0.0)
        h = _ref_conv1d_k3(h, p["conv2_w"], p["conv2_b"])
        h = _ref_group_norm(h, p["gn2_w"], p["gn2_b"], G)
        return jnp.maximum(h + xi, 0.0)

    return jax.vmap(one)(x)


if __name__ == "__main__":
    B, C, L = 8, 32, 64   # chan=32 -> 4 groups of 8 channels
    key = jax.random.PRNGKey(0)
    k = jax.random.split(key, 6)

    x = jax.random.normal(k[0], (B, C, L), jnp.float32)
    scale = 1.0 / jnp.sqrt(3.0 * C)
    params = {
        "conv1_w": jax.random.normal(k[1], (C, C, 3), jnp.float32) * scale,
        "conv1_b": jax.random.normal(k[2], (C,), jnp.float32) * 0.1,
        "gn1_w": jnp.ones((C,), jnp.float32),
        "gn1_b": jnp.zeros((C,), jnp.float32),
        "conv2_w": jax.random.normal(k[3], (C, C, 3), jnp.float32) * scale,
        "conv2_b": jax.random.normal(k[4], (C,), jnp.float32) * 0.1,
        "gn2_w": jnp.ones((C,), jnp.float32),
        "gn2_b": jnp.zeros((C,), jnp.float32),
    }

    ref = jax.block_until_ready(resblock_reference(x, params))

    # Strict correctness check with f32 conv operands.
    out_f32 = jax.block_until_ready(
        resblock_forward(x, params, conv_dtype=jnp.float32))
    assert out_f32.shape == (B, C, L)
    assert jnp.max(jnp.abs(out_f32 - ref)) < 2e-4, "f32 path mismatch vs reference"

    # Default fast path (bf16 conv operands on the MXU); looser tolerance.
    out_bf16 = jax.block_until_ready(resblock_forward(x, params))
    assert out_bf16.shape == (B, C, L)
    assert jnp.max(jnp.abs(out_bf16 - ref)) < 6e-2, "bf16 path mismatch vs reference"

    print("KERNEL_OK")
</pallas_src>

<mosaic_0001>
module attributes {stable_mosaic.version = 11 : i64} {
  func.func @kernel(%arg0: i32, %arg1: memref<32x256xf32, #tpu.memory_space<vmem>>, %arg2: memref<32x96xf32, #tpu.memory_space<vmem>>, %arg3: memref<32x96xf32, #tpu.memory_space<vmem>>, %arg4: memref<32x8xf32, #tpu.memory_space<vmem>>, %arg5: memref<8x256xf32, #tpu.memory_space<vmem>>, %arg6: memref<64x64xf32, #tpu.memory_space<vmem>>, %arg7: memref<32x256xf32, #tpu.memory_space<vmem>>) attributes {dimension_semantics = [#tpu.dimension_semantics<parallel>], iteration_bounds = array<i64: 2>, scalar_prefetch = 0 : i64, scratch_operands = 0 : i64, tpu.core_type = #tpu.core_type<tc>, window_params = [{transform_indices = @transform_0, window_bounds = array<i64: 32, 256>}, {pipeline_mode = #tpu.pipeline_mode<synchronous>, transform_indices = @transform_1, window_bounds = array<i64: 32, 96>}, {pipeline_mode = #tpu.pipeline_mode<synchronous>, transform_indices = @transform_2, window_bounds = array<i64: 32, 96>}, {pipeline_mode = #tpu.pipeline_mode<synchronous>, transform_indices = @transform_3, window_bounds = array<i64: 32, 8>}, {pipeline_mode = #tpu.pipeline_mode<synchronous>, transform_indices = @transform_4, window_bounds = array<i64: 8, 256>}, {pipeline_mode = #tpu.pipeline_mode<synchronous>, transform_indices = @transform_5, window_bounds = array<i64: 64, 64>}, {transform_indices = @transform_6, window_bounds = array<i64: 32, 256>}]} {
    %0 = tpu.iota {dimensions = array<i32: 1>} : vector<1x256xi32>
    %c64_i32 = arith.constant 64 : i32
    %c0_i32 = arith.constant 0 : i32
    %1 = arith.cmpi eq, %c64_i32, %c0_i32 : i32
    %c1_i32 = arith.constant 1 : i32
    %2 = arith.select %1, %c1_i32, %c64_i32 : i32
    %3 = vector.broadcast %2 : i32 to vector<1x256xi32>
    %4 = arith.remsi %0, %3 : vector<1x256xi32>
    %c0_i32_0 = arith.constant 0 : i32
    %5 = vector.broadcast %c0_i32_0 : i32 to vector<1x256xi32>
    %6 = arith.cmpi ne, %4, %5 : vector<1x256xi32>
    %c0_i32_1 = arith.constant 0 : i32
    %7 = vector.broadcast %c0_i32_1 : i32 to vector<1x256xi32>
    %8 = arith.cmpi slt, %4, %7 : vector<1x256xi32>
    %c0_i32_2 = arith.constant 0 : i32
    %9 = arith.cmpi slt, %2, %c0_i32_2 : i32
    %10 = vector.broadcast %9 : i1 to vector<1x256xi1>
    %11 = vector.broadcast %10 : vector<1x256xi1> to vector<1x256xi1>
    %12 = arith.xori %8, %11 : vector<1x256xi1>
    %13 = arith.andi %12, %6 : vector<1x256xi1>
    %14 = vector.broadcast %2 : i32 to vector<1x256xi32>
    %15 = arith.addi %4, %14 : vector<1x256xi32>
    %16 = arith.select %13, %15, %4 : vector<1x256xi1>, vector<1x256xi32>
    %c0_i32_3 = arith.constant 0 : i32
    %17 = vector.broadcast %c0_i32_3 : i32 to vector<1x256xi32>
    %18 = arith.cmpi eq, %16, %17 : vector<1x256xi32>
    %c63_i32 = arith.constant 63 : i32
    %19 = vector.broadcast %c63_i32 : i32 to vector<1x256xi32>
    %20 = arith.cmpi eq, %16, %19 : vector<1x256xi32>
    %c0 = arith.constant 0 : index
    %c0_4 = arith.constant 0 : index
    %21 = vector.load %arg4[%c0, %c0_4] : memref<32x8xf32, #tpu.memory_space<vmem>>, vector<32x1xf32>
    %c0_5 = arith.constant 0 : index
    %c1 = arith.constant 1 : index
    %22 = vector.load %arg4[%c0_5, %c1] : memref<32x8xf32, #tpu.memory_space<vmem>>, vector<32x1xf32>
    %c0_6 = arith.constant 0 : index
    %c2 = arith.constant 2 : index
    %23 = vector.load %arg4[%c0_6, %c2] : memref<32x8xf32, #tpu.memory_space<vmem>>, vector<32x1xf32>
    %c0_7 = arith.constant 0 : index
    %c3 = arith.constant 3 : index
    %24 = vector.load %arg4[%c0_7, %c3] : memref<32x8xf32, #tpu.memory_space<vmem>>, vector<32x1xf32>
    %c0_8 = arith.constant 0 : index
    %c4 = arith.constant 4 : index
    %25 = vector.load %arg4[%c0_8, %c4] : memref<32x8xf32, #tpu.memory_space<vmem>>, vector<32x1xf32>
    %c0_9 = arith.constant 0 : index
    %c5 = arith.constant 5 : index
    %26 = vector.load %arg4[%c0_9, %c5] : memref<32x8xf32, #tpu.memory_space<vmem>>, vector<32x1xf32>
    %c0_10 = arith.constant 0 : index
    %c0_11 = arith.constant 0 : index
    %27 = vector.load %arg5[%c0_10, %c0_11] : memref<8x256xf32, #tpu.memory_space<vmem>>, vector<8x256xf32>
    %c0_12 = arith.constant 0 : index
    %c0_13 = arith.constant 0 : index
    %28 = vector.load %arg6[%c0_12, %c0_13] : memref<64x64xf32, #tpu.memory_space<vmem>>, vector<64x64xf32>
    %c0_14 = arith.constant 0 : index
    %c0_15 = arith.constant 0 : index
    %29 = vector.load %arg1[%c0_14, %c0_15] : memref<32x256xf32, #tpu.memory_space<vmem>>, vector<32x256xf32>
    %c1_i32_16 = arith.constant 1 : i32
    %30 = tpu.dynamic_rotate %29 by %c1_i32_16 dim 1 : vector<32x256xf32>, i32 -> vector<32x256xf32>
    %cst = arith.constant 0.000000e+00 : f32
    %31 = vector.shape_cast %18 : vector<1x256xi1> to vector<1x256xi1>
    %32 = vector.broadcast %31 : vector<1x256xi1> to vector<32x256xi1>
    %33 = vector.broadcast %cst : f32 to vector<32x256xf32>
    %34 = arith.select %32, %33, %30 : vector<32x256xi1>, vector<32x256xf32>
    %c255_i32 = arith.constant 255 : i32
    %35 = tpu.dynamic_rotate %29 by %c255_i32 dim 1 : vector<32x256xf32>, i32 -> vector<32x256xf32>
    %cst_17 = arith.constant 0.000000e+00 : f32
    %36 = vector.shape_cast %20 : vector<1x256xi1> to vector<1x256xi1>
    %37 = vector.broadcast %36 : vector<1x256xi1> to vector<32x256xi1>
    %38 = vector.broadcast %cst_17 : f32 to vector<32x256xf32>
    %39 = arith.select %37, %38, %35 : vector<32x256xi1>, vector<32x256xf32>
    %40 = tpu.concatenate %34, %29, %39 in 0 : vector<32x256xf32>, vector<32x256xf32>, vector<32x256xf32> -> vector<96x256xf32>
    %c0_18 = arith.constant 0 : index
    %c0_19 = arith.constant 0 : index
    %41 = vector.load %arg2[%c0_18, %c0_19] : memref<32x96xf32, #tpu.memory_space<vmem>>, vector<32x96xf32>
    %cst_20 = arith.constant dense<0.000000e+00> : vector<32x256xf32>
    %42 = tpu.matmul %41, %40, %cst_20 {dimension_numbers = #tpu.dot_dimension_numbers<[1], [0], [0], [1], [0, 0, 1, 1], [], []>} : vector<32x96xf32>, vector<96x256xf32>, vector<32x256xf32> -> vector<32x256xf32>
    %43 = vector.broadcast %21 : vector<32x1xf32> to vector<32x256xf32>
    %44 = arith.addf %42, %43 : vector<32x256xf32>
    %45 = arith.mulf %44, %44 : vector<32x256xf32>
    %46 = tpu.concatenate %44, %45 in 0 : vector<32x256xf32>, vector<32x256xf32> -> vector<64x256xf32>
    %cst_21 = arith.constant dense<0.000000e+00> : vector<64x8xf32>
    %47 = tpu.matmul %46, %27, %cst_21 {dimension_numbers = #tpu.dot_dimension_numbers<[1], [1], [0], [0], [0, 0, 1, 0], [], []>} : vector<64x256xf32>, vector<8x256xf32>, vector<64x8xf32> -> vector<64x8xf32>
    %cst_22 = arith.constant dense<0.000000e+00> : vector<64x8xf32>
    %48 = tpu.matmul %28, %47, %cst_22 {dimension_numbers = #tpu.dot_dimension_numbers<[1], [0], [0], [1], [0, 0, 1, 1], [], []>} : vector<64x64xf32>, vector<64x8xf32>, vector<64x8xf32> -> vector<64x8xf32>
    %49 = vector.extract_strided_slice %48 {offsets = [0, 0], sizes = [32, 8], strides = [1, 1]} : vector<64x8xf32> to vector<32x8xf32>
    %50 = vector.extract_strided_slice %48 {offsets = [32, 0], sizes = [32, 8], strides = [1, 1]} : vector<64x8xf32> to vector<32x8xf32>
    %51 = arith.mulf %49, %49 : vector<32x8xf32>
    %52 = arith.subf %50, %51 : vector<32x8xf32>
    %cst_23 = arith.constant 9.99999974E-6 : f32
    %53 = vector.broadcast %cst_23 : f32 to vector<32x8xf32>
    %54 = arith.addf %52, %53 : vector<32x8xf32>
    %55 = math.rsqrt %54 : vector<32x8xf32>
    %56 = vector.broadcast %22 : vector<32x1xf32> to vector<32x8xf32>
    %57 = arith.mulf %55, %56 : vector<32x8xf32>
    %58 = arith.mulf %49, %57 : vector<32x8xf32>
    %59 = vector.broadcast %23 : vector<32x1xf32> to vector<32x8xf32>
    %60 = arith.subf %59, %58 : vector<32x8xf32>
    %61 = tpu.concatenate %57, %60 in 0 : vector<32x8xf32>, vector<32x8xf32> -> vector<64x8xf32>
    %cst_24 = arith.constant dense<0.000000e+00> : vector<64x256xf32>
    %62 = tpu.matmul %61, %27, %cst_24 {dimension_numbers = #tpu.dot_dimension_numbers<[1], [0], [0], [1], [0, 0, 1, 1], [], []>} : vector<64x8xf32>, vector<8x256xf32>, vector<64x256xf32> -> vector<64x256xf32>
    %63 = vector.extract_strided_slice %62 {offsets = [0, 0], sizes = [32, 256], strides = [1, 1]} : vector<64x256xf32> to vector<32x256xf32>
    %64 = arith.mulf %44, %63 : vector<32x256xf32>
    %65 = vector.extract_strided_slice %62 {offsets = [32, 0], sizes = [32, 256], strides = [1, 1]} : vector<64x256xf32> to vector<32x256xf32>
    %66 = arith.addf %64, %65 : vector<32x256xf32>
    %cst_25 = arith.constant 0.000000e+00 : f32
    %67 = vector.broadcast %cst_25 : f32 to vector<32x256xf32>
    %68 = arith.maximumf %66, %67 : vector<32x256xf32>
    %c1_i32_26 = arith.constant 1 : i32
    %69 = tpu.dynamic_rotate %68 by %c1_i32_26 dim 1 : vector<32x256xf32>, i32 -> vector<32x256xf32>
    %cst_27 = arith.constant 0.000000e+00 : f32
    %70 = vector.shape_cast %18 : vector<1x256xi1> to vector<1x256xi1>
    %71 = vector.broadcast %70 : vector<1x256xi1> to vector<32x256xi1>
    %72 = vector.broadcast %cst_27 : f32 to vector<32x256xf32>
    %73 = arith.select %71, %72, %69 : vector<32x256xi1>, vector<32x256xf32>
    %c255_i32_28 = arith.constant 255 : i32
    %74 = tpu.dynamic_rotate %68 by %c255_i32_28 dim 1 : vector<32x256xf32>, i32 -> vector<32x256xf32>
    %cst_29 = arith.constant 0.000000e+00 : f32
    %75 = vector.shape_cast %20 : vector<1x256xi1> to vector<1x256xi1>
    %76 = vector.broadcast %75 : vector<1x256xi1> to vector<32x256xi1>
    %77 = vector.broadcast %cst_29 : f32 to vector<32x256xf32>
    %78 = arith.select %76, %77, %74 : vector<32x256xi1>, vector<32x256xf32>
    %79 = tpu.concatenate %73, %68, %78 in 0 : vector<32x256xf32>, vector<32x256xf32>, vector<32x256xf32> -> vector<96x256xf32>
    %c0_30 = arith.constant 0 : index
    %c0_31 = arith.constant 0 : index
    %80 = vector.load %arg3[%c0_30, %c0_31] : memref<32x96xf32, #tpu.memory_space<vmem>>, vector<32x96xf32>
    %cst_32 = arith.constant dense<0.000000e+00> : vector<32x256xf32>
    %81 = tpu.matmul %80, %79, %cst_32 {dimension_numbers = #tpu.dot_dimension_numbers<[1], [0], [0], [1], [0, 0, 1, 1], [], []>} : vector<32x96xf32>, vector<96x256xf32>, vector<32x256xf32> -> vector<32x256xf32>
    %82 = vector.broadcast %24 : vector<32x1xf32> to vector<32x256xf32>
    %83 = arith.addf %81, %82 : vector<32x256xf32>
    %84 = arith.mulf %83, %83 : vector<32x256xf32>
    %85 = tpu.concatenate %83, %84 in 0 : vector<32x256xf32>, vector<32x256xf32> -> vector<64x256xf32>
    %cst_33 = arith.constant dense<0.000000e+00> : vector<64x8xf32>
    %86 = tpu.matmul %85, %27, %cst_33 {dimension_numbers = #tpu.dot_dimension_numbers<[1], [1], [0], [0], [0, 0, 1, 0], [], []>} : vector<64x256xf32>, vector<8x256xf32>, vector<64x8xf32> -> vector<64x8xf32>
    %cst_34 = arith.constant dense<0.000000e+00> : vector<64x8xf32>
    %87 = tpu.matmul %28, %86, %cst_34 {dimension_numbers = #tpu.dot_dimension_numbers<[1], [0], [0], [1], [0, 0, 1, 1], [], []>} : vector<64x64xf32>, vector<64x8xf32>, vector<64x8xf32> -> vector<64x8xf32>
    %88 = vector.extract_strided_slice %87 {offsets = [0, 0], sizes = [32, 8], strides = [1, 1]} : vector<64x8xf32> to vector<32x8xf32>
    %89 = vector.extract_strided_slice %87 {offsets = [32, 0], sizes = [32, 8], strides = [1, 1]} : vector<64x8xf32> to vector<32x8xf32>
    %90 = arith.mulf %88, %88 : vector<32x8xf32>
    %91 = arith.subf %89, %90 : vector<32x8xf32>
    %cst_35 = arith.constant 9.99999974E-6 : f32
    %92 = vector.broadcast %cst_35 : f32 to vector<32x8xf32>
    %93 = arith.addf %91, %92 : vector<32x8xf32>
    %94 = math.rsqrt %93 : vector<32x8xf32>
    %95 = vector.broadcast %25 : vector<32x1xf32> to vector<32x8xf32>
    %96 = arith.mulf %94, %95 : vector<32x8xf32>
    %97 = arith.mulf %88, %96 : vector<32x8xf32>
    %98 = vector.broadcast %26 : vector<32x1xf32> to vector<32x8xf32>
    %99 = arith.subf %98, %97 : vector<32x8xf32>
    %100 = tpu.concatenate %96, %99 in 0 : vector<32x8xf32>, vector<32x8xf32> -> vector<64x8xf32>
    %cst_36 = arith.constant dense<0.000000e+00> : vector<64x256xf32>
    %101 = tpu.matmul %100, %27, %cst_36 {dimension_numbers = #tpu.dot_dimension_numbers<[1], [0], [0], [1], [0, 0, 1, 1], [], []>} : vector<64x8xf32>, vector<8x256xf32>, vector<64x256xf32> -> vector<64x256xf32>
    %102 = vector.extract_strided_slice %101 {offsets = [0, 0], sizes = [32, 256], strides = [1, 1]} : vector<64x256xf32> to vector<32x256xf32>
    %103 = arith.mulf %83, %102 : vector<32x256xf32>
    %104 = vector.extract_strided_slice %101 {offsets = [32, 0], sizes = [32, 256], strides = [1, 1]} : vector<64x256xf32> to vector<32x256xf32>
    %105 = arith.addf %103, %104 : vector<32x256xf32>
    %c0_37 = arith.constant 0 : index
    %c0_38 = arith.constant 0 : index
    %106 = vector.load %arg1[%c0_37, %c0_38] : memref<32x256xf32, #tpu.memory_space<vmem>>, vector<32x256xf32>
    %107 = arith.addf %105, %106 : vector<32x256xf32>
    %cst_39 = arith.constant 0.000000e+00 : f32
    %108 = vector.broadcast %cst_39 : f32 to vector<32x256xf32>
    %109 = arith.maximumf %107, %108 : vector<32x256xf32>
    %c0_40 = arith.constant 0 : index
    %c0_41 = arith.constant 0 : index
    %110 = vector.load %arg7[%c0_40, %c0_41] : memref<32x256xf32, #tpu.memory_space<vmem>>, vector<32x256xf32>
    tpu.vector_store %arg7[%c0_40, %c0_41], %109 {strides = array<i32>} : memref<32x256xf32, #tpu.memory_space<vmem>>, vector<32x256xf32>,
    return
  }
  func.func @transform_0(%arg0: i32) -> (i32, i32) {
    %c0_i32 = arith.constant 0 : i32
    %c0_i32_0 = arith.constant 0 : i32
    return %c0_i32, %arg0 : i32, i32
  }
  func.func @transform_1(%arg0: i32) -> (i32, i32) {
    %c0_i32 = arith.constant 0 : i32
    %c0_i32_0 = arith.constant 0 : i32
    %c0_i32_1 = arith.constant 0 : i32
    return %c0_i32, %c0_i32_0 : i32, i32
  }
  func.func @transform_2(%arg0: i32) -> (i32, i32) {
    %c0_i32 = arith.constant 0 : i32
    %c0_i32_0 = arith.constant 0 : i32
    %c0_i32_1 = arith.constant 0 : i32
    return %c0_i32, %c0_i32_0 : i32, i32
  }
  func.func @transform_3(%arg0: i32) -> (i32, i32) {
    %c0_i32 = arith.constant 0 : i32
    %c0_i32_0 = arith.constant 0 : i32
    %c0_i32_1 = arith.constant 0 : i32
    return %c0_i32, %c0_i32_0 : i32, i32
  }
  func.func @transform_4(%arg0: i32) -> (i32, i32) {
    %c0_i32 = arith.constant 0 : i32
    %c0_i32_0 = arith.constant 0 : i32
    %c0_i32_1 = arith.constant 0 : i32
    return %c0_i32, %c0_i32_0 : i32, i32
  }
  func.func @transform_5(%arg0: i32) -> (i32, i32) {
    %c0_i32 = arith.constant 0 : i32
    %c0_i32_0 = arith.constant 0 : i32
    %c0_i32_1 = arith.constant 0 : i32
    return %c0_i32, %c0_i32_0 : i32, i32
  }
  func.func @transform_6(%arg0: i32) -> (i32, i32) {
    %c0_i32 = arith.constant 0 : i32
    %c0_i32_0 = arith.constant 0 : i32
    return %c0_i32, %arg0 : i32, i32
  }
}

</mosaic_0001>

<bundles_post_ra>
// kernel: tpu_custom_call.1
= control target key start
LH: loop header
LB: loop body
LE: loop exit
PB: predicated region body
PF: predicated region fallthrough
CT: control target
= control target key end

     0   :  { %11 = vsyncpa [#allocation3], 0  ;;  %s3195_s0 = inlined_call_operand.hbm [shape: f32[32,512], index: 0, kind: input, shape index: {}]   ;;  %s3196_s1 = inlined_call_operand.vmem [shape: f32[32,96], index: 1, kind: input, shape index: {}]   ;;  %s3197_s2 = inlined_call_operand.hbm [shape: f32[32,96], index: 2, kind: input, shape index: {}]   ;;  %s3198_s3 = inlined_call_operand.vmem [shape: f32[32,8], index: 3, kind: input, shape index: {}]   ;;  %s3199_s4 = inlined_call_operand.vmem [shape: f32[8,256], index: 4, kind: input, shape index: {}]   ;;  %s3200_s5 = inlined_call_operand.hbm [shape: f32[64,64], index: 5, kind: input, shape index: {}]   ;;  %s3201_s6 = inlined_call_operand.hbm [shape: f32[32,512], index: 6, kind: output, shape index: {}]  }
   0x1   :  { %13 = vsyncpa [#allocation3 + $0x1], 0 }
   0x2   :  { %14 = vsyncpa [#allocation6], 0 }
   0x3   :  { %15 = vsyncpa [#allocation4], 0 }
   0x4   :  { %17 = vsyncpa [#allocation4 + $0x1], 0  ;;  %s2493_s21 = smov 0   ;;  %s2495_s22 = smov 0  }
   0x5   :  { %s2497_s23 = smov 0   ;;  %s2499_s24 = smov 0  }
   0x6 LB: > { %s2514_s25 = sadd.s32 4294967295, %s2435_s24   ;;  %s1765_s26 = sadd.s32 4294967294, %s2435_s24   ;;  %s2435_s24 = sphi %s2499_s24, %s3237_s24   ;;  %s2431_s23 = sphi %s2497_s23, %s3236_s23   ;;  %s2427_s22 = sphi %s2495_s22, %s3235_s22   ;;  %s2423_s21 = sphi %s2493_s21, %s3234_s21  }
   0x7   : > { %s2518_s27 = sadd.s32 1, %s2435_s24   ;;  %s30_s28 = sadd.s32 1, %s2431_s23 }
   0x8   : > { %s27_s29 = ssub.s32 %s2435_s24, %s2518_s27  ;;  %p37_p0 = scmp.ne.s32.totalorder %s2431_s23, %s2427_s22 }
   0x9   : > { %p28_p1 = scmp.eq.s32.totalorder %s27_s29, 0  ;;  %p38_p2 = scmp.eq.s32.totalorder %s2435_s24, 0 }
   0xa   : > { %p43_p3 = scmp.ne.s32.totalorder %s2427_s22, %s2423_s21  ;;  %p3202_p4 = scmp.eq.s32.totalorder %s2514_s25, 0 }
   0xb   : > { %s2530_s30 = scalar_select %p28_p1, %s2431_s23, %s30_s28  }
   0xc   : > { %p2532_p5 = por %p38_p2, %p37_p0  ;;  %p2538_p6 = por %p3202_p4, %p43_p3 }
   0xd   : > { %3207 = sst [smem:[#allocation12_spill]] %s2530_s30  ;;  %p172_p7 = scmp.eq.s32.totalorder %s2514_s25, 1 }
   0xe   : > { %s3208_s7 = scalar_select %p2532_p5, 1, 0 }
   0xf   : > { %s3209_s8 = scalar_select %p2538_p6, 1, 0 }
  0x10   : > { %p178_p8 = scmp.eq.s32.totalorder %s1765_s26, 1  ;;  %p1766_p9 = scmp.ge.s32.totalorder %s2435_s24, 1 }
  0x11   : > { %p185_p10 = scmp.lt.s32.totalorder %s2435_s24, 3  ;;  %p2545_p11 = por %p172_p7, %p37_p0 }
  0x12   : > { %p2549_p12 = por %p178_p8, %p43_p3  ;;  %s2437_s12 = smov [#allocation5]  }
  0x13   : > { %s3210_s9 = scalar_select %p2545_p11, 1, 0 }
  0x14   : > { %s3211_s10 = scalar_select %p2549_p12, 1, 0 }
  0x15   : > { %p2553_p13 = pnand %p1766_p9, %p185_p10  ;;  %s200_s13 = sshll.u32 %s2437_s12, 4  ;;  %s201_s13 = int_to_ptr.vmem [resolvable:$true] %s200_s13 }
  0x16   : > { %s2438_s15 = smov [#allocation7]   ;;  %s2279_s19 = scalar_lea.hbm %s3197_s2, 512 }
  0x17   : > { %s3212_s11 = scalar_select %p2553_p13, 1, 0 }
  0x18   : > { %p2091_p1 = pneg %p2553_p13  ;;  %s219_s16 = sshll.u32 %s2438_s15, 4  ;;  %s220_s16 = int_to_ptr.vmem [resolvable:$true] %s219_s16 }
  0x19   : > { %p2280_p7 = scmp.ne.s32.totalorder %s3197_s2, %s2279_s19 }
  0x1a   : > { %p2561_p2 = pnand %p2091_p1, %p3202_p4  ;;  %p2286_p1 = scmp.lt.u32.totalorder %s2279_s19, %s3197_s2 }
  0x1c   : > { %p2281_p8 = pneg %p2561_p2 }
  0x1e   : > { %p2282_p9 = pnand %p2281_p8, %p2280_p7 }
  0x20   : > { %p2283_p10 = pneg %p2282_p9 }
  0x22   : > { %p2288_p0 = pnand %p2286_p1, %p2283_p10 }
  0x24   : > { %2291 = shalt.err (!%p2288_p0)
}
  0x25   : > { %s2292_s12 = scalar_lea.vmem %s201_s13, 512  ;;  %p2300_p11 = scmp.lt.s32.totalorder %s201_s13, %s201_s13 }
  0x26   : > { %p2293_p4 = scmp.ne.s32.totalorder %s201_s13, %s2292_s12  ;;  %p2301_p6 = scmp.lt.s32.totalorder %s2292_s12, %s2292_s12 }
  0x28   : > { %p2295_p3 = pnand %p2293_p4, %p2281_p8  ;;  %p2302_p13 = por %p2301_p6, %p2300_p11 }
  0x2a   : > { %p2296_p12 = pneg %p2295_p3 }
  0x2c   : > { %p2303_p5 = pnand %p2302_p13, %p2296_p12 }
  0x2e   : > { %2306 = shalt.err (!%p2303_p5)
}
  0x2f   : > { %s2439_s15 = smov 128   ;;  %s2440_s17 = smov 8  }
  0x30   : > { %2094 = dma.hbm_to_vmem [thread:$0]  (!%p2561_p2), %s3197_s2, 512, %s201_s13, [#allocation6], %s2439_s15, %s2439_s15, %s2440_s17  }
  0x31   : > { %p3214_p0 = scmp.ne.s32.totalorder %s3208_s7, 0  ;;  %p3215_p7 = scmp.lt.s32.totalorder %s2435_s24, 2 }
  0x32   : > { %s2307_s29 = scalar_lea.hbm %s3200_s5, 1024 }
  0x33   : > { %p2593_p4 = pnand %p3215_p7, %p3214_p0  ;;  %p2308_p5 = scmp.ne.s32.totalorder %s3200_s5, %s2307_s29 }
  0x34   : > { %p2314_p12 = scmp.lt.u32.totalorder %s2307_s29, %s3200_s5 }
  0x35   : > { %s3216_s20 = scalar_select %p2593_p4, 1, 0 }
  0x36   : > { %p2310_p6 = pnand %p2308_p5, %p2281_p8 }
  0x38   : > { %p2311_p11 = pneg %p2310_p6 }
  0x3a   : > { %p2316_p13 = pnand %p2314_p12, %p2311_p11 }
  0x3c   : > { %2319 = shalt.err (!%p2316_p13)
}
  0x3d   : > { %s2320_s18 = scalar_lea.vmem %s220_s16, 1024  ;;  %p2328_p1 = scmp.lt.s32.totalorder %s220_s16, %s220_s16 }
  0x3e   : > { %p2321_p3 = scmp.ne.s32.totalorder %s220_s16, %s2320_s18  ;;  %p2329_p0 = scmp.lt.s32.totalorder %s2320_s18, %s2320_s18 }
  0x40   : > { %p2323_p9 = pnand %p2321_p3, %p2281_p8  ;;  %p2330_p7 = por %p2329_p0, %p2328_p1 }
  0x42   : > { %p2324_p10 = pneg %p2323_p9 }
  0x44   : > { %p2331_p4 = pnand %p2330_p7, %p2324_p10 }
  0x46   : > { %2334 = shalt.err (!%p2331_p4)
}
  0x47   : > { %2097 = dma.hbm_to_vmem [thread:$0]  (!%p2561_p2), %s3200_s5, 1024, %s220_s16, [#allocation6], %s2439_s15, %s2439_s15, %s2440_s17  }
  0x48   : > { %s233_s26 = sand.u32 1, %s2431_s23   ;;  %s1887_s29 = sshll.u32 %s2435_s24, 8 }
  0x49   : > { %s1770_s28 = sshll.u32 %s233_s26, 6  ;;  %s2622_s7 = scalar_lea.hbm %s3195_s0, %s1887_s29 }
  0x4a   : > { %s237_s14 = scalar_lea.vmem [#allocation2], %s1770_s28  ;;  %s2626_s30 = scalar_lea.sflag [#allocation3], %s233_s26 }
  0x4b   : > { %s244_s18 = sshll.u32 %s237_s14, 4  ;;  %s2335_s19 = scalar_lea.hbm %s2622_s7, 1024  ;;  %s2624_s18 = int_to_ptr.vmem [resolvable:$true] %s244_s18 }
  0x4c   : > { %p2336_p2 = scmp.ne.s32.totalorder %s2622_s7, %s2335_s19  ;;  %p3217_p8 = scmp.ne.s32.totalorder %s3216_s20, 0 }
  0x4d   : > { %s2340_s17 = scalar_lea.hbm %s3195_s0, 2048  ;;  %p2341_p11 = scmp.lt.u32.totalorder %s2622_s7, %s3195_s0 }
  0x4e   : > { %p2337_p4 = pneg %p3217_p8  ;;  %p2342_p12 = scmp.lt.u32.totalorder %s2340_s17, %s2335_s19 }
  0x4f   : > { %p2344_p3 = scmp.lt.u32.totalorder %s2335_s19, %s2622_s7 }
  0x50   : > { %p2338_p5 = pnand %p2337_p4, %p2336_p2  ;;  %p2343_p13 = por %p2342_p12, %p2341_p11 }
  0x52   : > { %p2339_p6 = pneg %p2338_p5  ;;  %p2345_p9 = por %p2344_p3, %p2343_p13 }
  0x54   : > { %p2346_p10 = pnand %p2345_p9, %p2339_p6 }
  0x56   : > { %2349 = shalt.err (!%p2346_p10)
}
  0x57   : > { %s2350_s26 = scalar_lea.vmem %s2624_s18, 1024  ;;  %s2441_s28 = smov [#allocation2]  }
  0x58   : > { %p2351_p1 = scmp.ne.s32.totalorder %s2624_s18, %s2350_s26  ;;  %s2355_s13 = sshll.u32 %s2441_s28, 4  ;;  %s2356_s13 = int_to_ptr.vmem [resolvable:$false] %s2355_s13 }
  0x59   : > { %s2357_s14 = scalar_lea.vmem %s2356_s13, 2048  ;;  %p2358_p2 = scmp.lt.s32.totalorder %s2624_s18, %s2356_s13 }
  0x5a   : > { %p2353_p0 = pnand %p2351_p1, %p2337_p4  ;;  %p2359_p5 = scmp.lt.s32.totalorder %s2357_s14, %s2350_s26 }
  0x5c   : > { %p2354_p7 = pneg %p2353_p0  ;;  %p2360_p11 = por %p2359_p5, %p2358_p2 }
  0x5e   : > { %p2361_p12 = pnand %p2360_p11, %p2354_p7 }
  0x60   : > { %2364 = shalt.err (!%p2361_p12)
}
  0x61   : > { %s2442_s19 = smov 512   ;;  %s2443_s16 = smov 256  }
  0x62   : > { %s2444_s15 = smov 16   ;;  %p3218_p4 = scmp.ne.s32.totalorder %s3212_s11, 0 }
  0x63   : > { %2101 = dma.hbm_to_vmem [thread:$0]  (!%p3217_p8), %s2622_s7, 1024, %s2624_s18, %s2626_s30, %s2442_s19, %s2443_s16, %s2444_s15  }
  0x64   : > { %256 = sbr.rel (%p3218_p4) target bundleno = 2313 (0x909), region = 44  ;;  %s2657_s17 = sand.u32 (!%p3218_p4), 1, %s2427_s22  }
  0x65   : > { %s1774_s29 = sshll.u32 (!%p3218_p4), %s2657_s17, 6  ;;  %s259_s12 = scalar_lea.sflag (!%p3218_p4), [#allocation3], %s2657_s17 }
  0x66   : > { %s2663_s26 = scalar_lea.vmem (!%p3218_p4), [#allocation2], %s1774_s29  ;;  %p3219_p6 = scmp.ne.s32.totalorder (!%p3218_p4), %s3209_s8, 0 }
  0x6b   : > { %2410 = dma.done.wait (%p3219_p6), %s259_s12, 1024  }
  0x6c   : > { %2412 = vsyncadd (%p3219_p6), %s259_s12, 4294966272  ;;  %p3220_p8 = scmp.eq.s32.totalorder %s2514_s25, 0 }
  0x6e   : > { %2414 = dma.done.wait (%p3220_p8), [#allocation6], 1536   ;;  %p3221_p13 = pmov %p3220_p8 }
  0x6f   : > { %v2674_v0 = vld [vmem:[%s2663_s26 + $0x20] sm:$0xff]  ;;  %v2677_v1 = vld [vmem:[%s2663_s26 + $0x30] sm:$0xff]  ;;  %v2688_v5 = vld [vmem:[%s2663_s26 + $0x28] sm:$0xff]  ;;  %s2445_s8 = smov 1   ;;  %s2446_s11 = smov 127   ;;  %v2447_v12 = vmov 0.0   ;;  %v301_v18 = vlaneseq }
  0x70   : > { %2416 = vsyncadd (%p3221_p13), [#allocation6], 4294965760  ;;  %v2680_v2 = vld [vmem:[%s2663_s26] sm:$0xff]  ;;  %v2173_v3 = vpack.i.bf16 %v2677_v1, %v2674_v0  ;;  %v2685_v4 = vld [vmem:[%s2663_s26 + $0x10] sm:$0xff]  ;;  %529 = vmatprep.mubr.f32.mxu0 %v2447_v12  ;;  %v2448_v15 = vmov 0   ;;  %vm452_vm10 = vcmask 785408  }
  0x71   : > { %v2691_v6 = vld [vmem:[%s2663_s26 + $0x38] sm:$0xff]  ;;  %v2163_v7 = vpack.i.bf16 %v2685_v4, %v2680_v2  ;;  %v2696_v8 = vld [vmem:[%s2663_s26 + $0x8] sm:$0xff]  ;;  %v2717_v13 = vld [vmem:[%s3198_s3 + $0x10] sm:$0xff]  ;;  %2204 = vset.pattern.permute.xlu1 %v2448_v15  ;;  %2203 = vset.pattern.permute.xlu0 %v2448_v15  ;;  %v2738_v19 = vand.u32 127, %v301_v18  ;;  %v1995_v58 = vpack.c.bf16 %v2685_v4, %v2680_v2  ;;  %vm667_vm11 = vcmask 523264   ;;  %p3230_p9 = scmp.ne.s32.totalorder %s3210_s9, 0 }
  0x72   : > { %v2699_v9 = vld [vmem:[%s2663_s26 + $0x18] sm:$0xff]  ;;  %2174 = vrot.lane.b32.xlu1 %v2173_v3, %s2445_s8  ;;  %v2178_v10 = vpack.i.bf16 %v2691_v6, %v2688_v5  ;;  %v2722_v14 = vld [vmem:[%s3198_s3] sm:$0xff]  ;;  %v2729_v16 = vld [vmem:[%s3198_s3 + $0x8] sm:$0xff]  ;;  %v1997_v61 = vpack.c.bf16 %v2691_v6, %v2688_v5  ;;  %vm857_vm12 = vcmask 64512   ;;  %s2454_s18 = smov [#allocation8]  }
  0x73   : > { %2164 = vrot.lane.b32.xlu0 %v2163_v7, %s2445_s8  ;;  %v2168_v11 = vpack.i.bf16 %v2699_v9, %v2696_v8  ;;  %v2734_v17 = vld [vmem:[%s3198_s3 + $0x18] sm:$0xff]  ;;  %v303_v20 = vadd.s32 128, %v2738_v19  ;;  %v308_v24 = vand.u32 63, %v2738_v19  ;;  %vm370_vm0 = vcmp.lt.s32.totalorder %v2738_v19, 1  ;;  %s2369_s30 = sshll.u32 %s2454_s18, 4  ;;  %s2370_s30 = int_to_ptr.vmem [resolvable:$false] %s2369_s30 }
  0x74   : > { %v1993_v50 = vpack.c.bf16 %v2699_v9, %v2696_v8  ;;  %vm407_vm5 = vcmp.lt.s32.totalorder %v2738_v19, 127  ;;  %v1999_v8 = vpack.c.bf16 %v2677_v1, %v2674_v0  ;;  %v1085_v19 = vld [vmem:[#allocation5 + $0x10] sm:$0xff] }
  0x75   : > { %v315_v23 = vand.u32 63, %v303_v20  ;;  %vm1890_vm2 = vcmp.ne.s32.totalorder %v308_v24, 0  ;;  %vm1892_vm8 = vcmp.ne.s32.totalorder %v308_v24, 63  ;;  %v431_v24 = vld [vmem:[%s3196_s1 + $0x18] sm:$0xff] }
  0x76   : > { %2179 = vrot.lane.b32.xlu1 %v2178_v10, %s2445_s8  ;;  %vm2759_vm4 = vmpackc.low %vm1890_vm2, %vm1890_vm2 }
  0x77   : > { %2169 = vrot.lane.b32.xlu0 %v2168_v11, %s2445_s8  ;;  %vm1889_vm1 = vcmp.ne.s32.totalorder %v315_v23, 0  ;;  %vm1891_vm6 = vcmp.ne.s32.totalorder %v315_v23, 63  ;;  %vm2806_vm9 = vmpackc.low %vm1892_vm8, %vm1892_vm8  ;;  %v430_v23 = vld [vmem:[%s3196_s1 + $0x10] sm:$0xff] }
  0x78   : > { %vm2751_vm3 = vmpackc.low %vm1889_vm1, %vm1889_vm1 }
  0x79   : > { %vm2796_vm7 = vmpackc.low %vm1891_vm6, %vm1891_vm6 }
  0x7a   : > { %2189 = vrot.lane.b32.xlu1 %v2168_v11, %s2446_s11 }
  0x7b   : > { %2184 = vrot.lane.b32.xlu0 %v2163_v7, %s2446_s11 }
  0x7e   : > { %2199 = vrot.lane.b32.xlu1 %v2178_v10, %s2446_s11  ;;  %v1086_v10 = vld [vmem:[#allocation5 + $0x18] sm:$0xff] }
  0x7f   : > { %2194 = vrot.lane.b32.xlu0 %v2173_v3, %s2446_s11 }
  0x82   : > { %434 = vperm.xlu1 %2204, %v2722_v14  }
  0x83   : > { %444 = vperm.xlu0 %2203, %v2717_v13  }
  0x86   : > { %449 = vperm.xlu1 %2204, %v2734_v17  }
  0x87   : > { %439 = vperm.xlu0 %2203, %v2729_v16  }
  0xe4   : > { %v2175_v21 = vpop.permute.xlu1 %2174 }
  0xe5   : > { %v2165_v22 = vpop.permute.xlu0 %2164  ;;  %v2177_v25 = vunpack.i.h.bf16 %v2175_v21  ;;  %v2176_v26 = vunpack.i.l.bf16 %v2175_v21  ;;  %v428_v21 = vld [vmem:[%s3196_s1] sm:$0xff] }
  0xe6   : > { %v2167_v31 = vunpack.i.h.bf16 %v2165_v22  ;;  %v2166_v32 = vunpack.i.l.bf16 %v2165_v22  ;;  %v429_v22 = vld [vmem:[%s3196_s1 + $0x8] sm:$0xff] }
  0xe8   : > { %v2180_v27 = vpop.permute.xlu1 %2179 }
  0xe9   : > { %v2182_v28 = vunpack.i.h.bf16 %v2180_v27  ;;  %v2181_v29 = vunpack.i.l.bf16 %v2180_v27  ;;  %v2170_v30 = vpop.permute.xlu0 %2169 }
  0xea   : > { %v2172_v33 = vunpack.i.h.bf16 %v2170_v30  ;;  %v2171_v34 = vunpack.i.l.bf16 %v2170_v30 }
  0xeb   : > { %v373_v35 = vsel %vm370_vm0, %v2176_v26, %v2181_v29  ;;  %v374_v36 = vsel %vm370_vm0, %v2177_v25, %v2182_v28  ;;  %v377_v47 = vsel %vm370_vm0, %v2181_v29, %v2176_v26  ;;  %v378_v48 = vsel %vm370_vm0, %v2182_v28, %v2177_v25  ;;  %v2838_v25 = vld [vmem:[%s3199_s4 + $0x8] sm:$0xff]  ;;  %v2844_v26 = vld [vmem:[%s3199_s4] sm:$0xff] }
  0xec   : > { %v371_v37 = vsel %vm370_vm0, %v2166_v32, %v2171_v34  ;;  %v372_v38 = vsel %vm370_vm0, %v2167_v31, %v2172_v33  ;;  %v375_v41 = vsel %vm370_vm0, %v2171_v34, %v2166_v32  ;;  %v376_v42 = vsel %vm370_vm0, %v2172_v33, %v2167_v31  ;;  %v2190_v44 = vpop.permute.xlu1 %2189  ;;  %2077 = vmatprep.subr.mxu1 %v2838_v25 }
  0xed   : > { %v1981_v40 = vpack.c.bf16 %v372_v38, %v371_v37  ;;  %v2185_v45 = vpop.permute.xlu0 %2184  ;;  %v1984_v46 = vpack.c.bf16 %v376_v42, %v375_v41  ;;  %v1987_v49 = vpack.c.bf16 %v374_v36, %v373_v35  ;;  %v2192_v51 = vunpack.i.h.bf16 %v2190_v44  ;;  %2078 = vmatpush1.xpose.msra.mxu1 %v2844_v26 }
  0xee   : > { %v2191_v52 = vunpack.i.l.bf16 %v2190_v44  ;;  %v2187_v53 = vunpack.i.h.bf16 %v2185_v45  ;;  %v2186_v54 = vunpack.i.l.bf16 %v2185_v45  ;;  %v1990_v55 = vpack.c.bf16 %v378_v48, %v377_v47 }
  0xef   : > { %1983 = vmatprep.subr.msk.bf16.mxu0 %vm2751_vm3, %v1981_v40 }
  0xf0   : > { %1986 = vmatpush1.bf16.msk.msra.mxu0 %vm2759_vm4, %v1984_v46  ;;  %v2200_v56 = vpop.permute.xlu1 %2199  ;;  %v413_v59 = vsel %vm407_vm5, %v2192_v51, %v2187_v53  ;;  %v412_v60 = vsel %vm407_vm5, %v2191_v52, %v2186_v54  ;;  %v409_v2 = vsel %vm407_vm5, %v2187_v53, %v2192_v51  ;;  %v408_v4 = vsel %vm407_vm5, %v2186_v54, %v2191_v52 }
  0xf1   : > { %1989 = vmatprep.subr.msk.bf16.mxu0 %vm2751_vm3, %v1987_v49  ;;  %v2195_v57 = vpop.permute.xlu0 %2194  ;;  %v2202_v62 = vunpack.i.h.bf16 %v2200_v56  ;;  %v2201_v63 = vunpack.i.l.bf16 %v2200_v56  ;;  %v2001_v9 = vpack.c.bf16 %v413_v59, %v412_v60  ;;  %v2004_v0 = vpack.c.bf16 %v409_v2, %v408_v4 }
  0xf2   : > { %v2197_v3 = vunpack.i.h.bf16 %v2195_v57  ;;  %v2196_v7 = vunpack.i.l.bf16 %v2195_v57  ;;  %v2893_v57 = vld [vmem:[#allocation7] sm:$0xff]  ;;  %v2450_v59 = vmov 2  }
  0xf4   : > { %1992 = vmatpush1.bf16.msk.msra.mxu0 %vm2759_vm4, %v1990_v55  ;;  %v415_v5 = vsel %vm407_vm5, %v2202_v62, %v2197_v3  ;;  %v414_v6 = vsel %vm407_vm5, %v2201_v63, %v2196_v7  ;;  %v411_v1 = vsel %vm407_vm5, %v2197_v3, %v2202_v62  ;;  %v410_v11 = vsel %vm407_vm5, %v2196_v7, %v2201_v63 }
  0xf5   : > { %1994 = vmatprep.subr.bf16.mxu0 %v1993_v50  ;;  %v2007_v15 = vpack.c.bf16 %v415_v5, %v414_v6  ;;  %v2010_v20 = vpack.c.bf16 %v411_v1, %v410_v11 }
  0xf8   : > { %1996 = vmatpush1.bf16.msra.mxu0 %v1995_v58  ;;  %v2449_v58 = vmov 1  }
  0xf9   : > { %1998 = vmatprep.subr.bf16.mxu0 %v1997_v61  ;;  %2205 = vset.pattern.permute.xlu1 %v2449_v58 }
  0xfa   : > { %2206 = vset.pattern.permute.xlu0 %v2449_v58  ;;  %814 = vperm.xlu1 %2205, %v2722_v14  }
  0xfb   : > { %818 = vperm.xlu0 %2206, %v2729_v16  }
  0xfc   : > { %2000 = vmatpush1.bf16.msra.mxu0 %v1999_v8 }
  0xfd   : > { %2003 = vmatprep.subr.msk.bf16.mxu0 %vm2796_vm7, %v2001_v9 }
  0xfe   : > { %822 = vperm.xlu1 %2205, %v2717_v13  }
  0xff   : > { %2207 = vset.pattern.permute.xlu0 %v2450_v59 }
 0x100   : > { %2006 = vmatpush1.bf16.msk.msra.mxu0 %vm2806_vm9, %v2004_v0  ;;  %838 = vperm.xlu0 %2207, %v2722_v14  }
 0x101   : > { %2009 = vmatprep.subr.msk.bf16.mxu0 %vm2796_vm7, %v2007_v15  ;;  %v435_v28 = vpop.permute.xlu1 %434 }
 0x102   : > { %v445_v27 = vpop.permute.xlu0 %444  ;;  %826 = vperm.xlu1 %2205, %v2734_v17  }
 0x104   : > { %2012 = vmatpush1.bf16.msk.msra.mxu0 %vm2806_vm9, %v2010_v20  ;;  %850 = vperm.xlu0 %2207, %v2734_v17  }
 0x105   : > { %562 = vmatprep.subr.mxu0 %v2838_v25  ;;  %v450_v45 = vpop.permute.xlu1 %449 }
 0x106   : > { %v440_v33 = vpop.permute.xlu0 %439  ;;  %2208 = vset.pattern.permute.xlu1 %v2450_v59 }
 0x107   : > { %1810 = vmatmul.mubr.msk.f32.vlgmr.msra.gmra.mrb[0].mxu0 %vm452_vm10, %v428_v21  ;;  %842 = vperm.xlu1 %2208, %v2729_v16  }
 0x108   : > { %535 = vmatprep.mubr.f32.mxu0 %v2447_v12 }
 0x10b   : > { %1811 = vmatmul.mubr.msk.f32.gmra.mrb[2].mxu0 %vm452_vm10, %v429_v22  ;;  %846 = vperm.xlu1 %2208, %v2717_v13  }
 0x10c   : > { %541 = vmatprep.mubr.f32.mxu0 %v2447_v12 }
 0x10d   : > { %563 = vmatpush1.xpose.msra.mxu0 %v2844_v26 }
 0x10e   : > { %882 = vmatprep.subr.mxu0 %v2838_v25 }
 0x10f   : > { %1812 = vmatmul.mubr.msk.f32.gmra.mrb[4].mxu0 %vm452_vm10, %v430_v23 }
 0x110   : > { %547 = vmatprep.mubr.f32.mxu0 %v2447_v12 }
 0x113   : > { %1813 = vmatmul.mubr.msk.f32.gmra.mrb[6].mxu0 %vm452_vm10, %v431_v24  ;;  %v2905_v24 = vld [vmem:[#allocation7 + $0x8] sm:$0xff] }
 0x1da   : > { %v531_v29 = vpop.f32.mrb[0].mxu0 }
 0x1db   : > { %v533_v30 = vpop.f32.mrb[1].mxu0  ;;  %v2852_v32 = vadd.f32 %v531_v29, %v435_v28  ;;  %v2915_v29 = vld [vmem:[#allocation7 + $0x20] sm:$0xff] }
 0x1dc   : > { %v2850_v31 = vadd.f32 %v533_v30, %v435_v28  ;;  %v2913_v28 = vld [vmem:[#allocation7 + $0x18] sm:$0xff]  ;;  %v2921_v30 = vld [vmem:[#allocation7 + $0x28] sm:$0xff] }
 0x1dd   : > { %v554_v50 = vmul.f32 %v2852_v32, %v2852_v32 }
 0x1de   : > { %v537_v34 = vpop.f32.mrb[2].mxu0  ;;  %626 = vmatprep.mubr.f32.mxu0 %v2850_v31  ;;  %v555_v49 = vmul.f32 %v2850_v31, %v2850_v31 }
 0x1df   : > { %v539_v35 = vpop.f32.mrb[3].mxu0  ;;  %627 = vmatmul.mubr.f32.vlgmr.msra.gmra.mrb[8].mxu0 %v2852_v32  ;;  %v2859_v37 = vadd.f32 %v537_v34, %v440_v33  ;;  %v2929_v34 = vld [vmem:[#allocation7 + $0x38] sm:$0xff] }
 0x1e0   : > { %v2856_v36 = vadd.f32 %v539_v35, %v440_v33  ;;  %883 = vmatpush1.msra.mxu0 %v2844_v26  ;;  %v2923_v33 = vld [vmem:[#allocation7 + $0x30] sm:$0xff] }
 0x1e1   : > { %1212 = vmatprep.subr.mxu0 %v2838_v25  ;;  %v556_v52 = vmul.f32 %v2859_v37, %v2859_v37 }
 0x1e2   : > { %v543_v38 = vpop.f32.mrb[4].mxu0  ;;  %631 = vmatprep.mubr.f32.mxu0 %v2856_v36  ;;  %v557_v51 = vmul.f32 %v2856_v36, %v2856_v36 }
 0x1e3   : > { %v545_v40 = vpop.f32.mrb[5].mxu0  ;;  %632 = vmatmul.mubr.f32.gmra.mrb[10].mxu0 %v2859_v37  ;;  %v2867_v42 = vadd.f32 %v543_v38, %v445_v27 }
 0x1e4   : > { %v2864_v41 = vadd.f32 %v545_v40, %v445_v27  ;;  %946 = vmatprep.mubr.f32.mxu0 %v2447_v12  ;;  %v2907_v27 = vld [vmem:[#allocation7 + $0x10] sm:$0xff] }
 0x1e5   : > { %v558_v54 = vmul.f32 %v2867_v42, %v2867_v42 }
 0x1e6   : > { %v549_v44 = vpop.f32.mrb[6].mxu0  ;;  %636 = vmatprep.mubr.f32.mxu1 %v2864_v41  ;;  %v559_v53 = vmul.f32 %v2864_v41, %v2864_v41 }
 0x1e7   : > { %v551_v46 = vpop.f32.mrb[7].mxu0  ;;  %637 = vmatmul.mubr.f32.vlgmr.msra.gmra.mrb[0].mxu1 %v2867_v42  ;;  %v2873_v48 = vadd.f32 %v549_v44, %v450_v45 }
 0x1e8   : > { %v2871_v47 = vadd.f32 %v551_v46, %v450_v45 }
 0x1e9   : > { %v560_v56 = vmul.f32 %v2873_v48, %v2873_v48 }
 0x1ea   : > { %641 = vmatprep.mubr.f32.mxu1 %v2871_v47  ;;  %v561_v55 = vmul.f32 %v2871_v47, %v2871_v47 }
 0x1eb   : > { %642 = vmatmul.mubr.f32.gmra.mrb[2].mxu1 %v2873_v48 }
 0x1ec   : > { %646 = vmatprep.mubr.f32.mxu1 %v555_v49 }
 0x1ef   : > { %647 = vmatmul.mubr.f32.gmra.mrb[4].mxu1 %v554_v50 }
 0x1f0   : > { %651 = vmatprep.mubr.f32.mxu1 %v557_v51 }
 0x1f3   : > { %652 = vmatmul.mubr.f32.gmra.mrb[6].mxu1 %v556_v52 }
 0x1f4   : > { %656 = vmatprep.mubr.f32.mxu1 %v559_v53 }
 0x1f7   : > { %657 = vmatmul.mubr.f32.gmra.mrb[8].mxu1 %v558_v54 }
 0x1f8   : > { %661 = vmatprep.mubr.f32.mxu1 %v561_v55 }
 0x1fb   : > { %662 = vmatmul.mubr.f32.gmra.mrb[10].mxu1 %v560_v56 }
 0x1fc   : > { %1941 = vmatprep.mubr.msk.f32.mxu1 %vm667_vm11, %v2893_v57 }
 0x2b2   : > { %v628_v60 = vpop.f32.mrb[8].mxu0 }
 0x2b3   : > { %v630_v61 = vpop.f32.mrb[9].mxu0 }
 0x2b6   : > { %v633_v62 = vpop.f32.mrb[10].mxu0 }
 0x2b7   : > { %v2013_v63 = vpack.c.bf16 %v633_v62, %v628_v60  ;;  %v635_v3 = vpop.f32.mrb[11].mxu0 }
 0x2b9   : > { %2014 = vmatprep.subr.bf16.mxu1 %v2013_v63 }
 0x2ba   : > { %v638_v7 = vpop.f32.mrb[0].mxu1  ;;  %2016 = vmatpush3.bf16.msra.mxu1 %v2013_v63  ;;  %v815_v63 = vpop.permute.xlu1 %814 }
 0x2bb   : > { %v640_v8 = vpop.f32.mrb[1].mxu1 }
 0x2bc   : > { %v819_v8 = vpop.permute.xlu0 %818 }
 0x2be   : > { %v643_v2 = vpop.f32.mrb[2].mxu1 }
 0x2bf   : > { %v2017_v4 = vpack.c.bf16 %v643_v2, %v638_v7  ;;  %v645_v9 = vpop.f32.mrb[3].mxu1  ;;  %v823_v7 = vpop.permute.xlu1 %822 }
 0x2c1   : > { %2018 = vmatprep.subr.bf16.mxu1 %v2017_v4 }
 0x2c2   : > { %v648_v5 = vpop.f32.mrb[4].mxu1  ;;  %2020 = vmatpush3.bf16.msra.mxu1 %v2017_v4 }
 0x2c3   : > { %v650_v6 = vpop.f32.mrb[5].mxu1 }
 0x2c6   : > { %v653_v0 = vpop.f32.mrb[6].mxu1 }
 0x2c7   : > { %v2021_v1 = vpack.c.bf16 %v653_v0, %v648_v5  ;;  %v655_v11 = vpop.f32.mrb[7].mxu1 }
 0x2c9   : > { %2022 = vmatprep.subr.bf16.mxu1 %v2021_v1 }
 0x2ca   : > { %v658_v15 = vpop.f32.mrb[8].mxu1  ;;  %2024 = vmatpush3.bf16.msra.mxu1 %v2021_v1  ;;  %v827_v1 = vpop.permute.xlu1 %826 }
 0x2cb   : > { %v660_v20 = vpop.f32.mrb[9].mxu1 }
 0x2ce   : > { %v663_v21 = vpop.f32.mrb[10].mxu1 }
 0x2cf   : > { %v2025_v22 = vpack.c.bf16 %v663_v21, %v658_v15  ;;  %v665_v23 = vpop.f32.mrb[11].mxu1 }
 0x2d1   : > { %2026 = vmatprep.subr.bf16.mxu1 %v2025_v22 }
 0x2d2   : > { %2028 = vmatpush3.bf16.msra.mxu1 %v2025_v22 }
 0x2d5   : > { %1942 = vmatmul.mubr.msk.f32.vlgmr.msra.gmra.mrb[12].mxu1 %vm667_vm11, %v2905_v24 }
 0x2d6   : > { %1944 = vmatprep.mubr.msk.f32.mxu1 %vm667_vm11, %v2907_v27 }
 0x2d9   : > { %1945 = vmatmul.mubr.msk.f32.gmra.mrb[14].mxu1 %vm667_vm11, %v2913_v28 }
 0x2da   : > { %1947 = vmatprep.mubr.msk.f32.mxu1 %vm667_vm11, %v2915_v29 }
 0x2dd   : > { %1948 = vmatmul.mubr.msk.f32.gmra.mrb[16].mxu1 %vm667_vm11, %v2921_v30 }
 0x2de   : > { %1950 = vmatprep.mubr.msk.f32.mxu1 %vm667_vm11, %v2923_v33 }
 0x2e1   : > { %1951 = vmatmul.mubr.msk.f32.gmra.mrb[18].mxu1 %vm667_vm11, %v2929_v34 }
 0x2e2   : > { %1179 = vmatprep.mubr.f32.mxu1 %v2447_v12 }
 0x3a8   : > { %v1943_v35 = vpop.f32.mrb[12].mxu1 }
 0x3a9   : > { %v758_v38 = vpop.f32.mrb[13].mxu1  ;;  %v798_v45 = vmul.f32 %v1943_v35, %v1943_v35 }
 0x3aa   : > { %v797_v46 = vmul.f32 %v758_v38, %v758_v38 }
 0x3ac   : > { %v1946_v40 = vpop.f32.mrb[14].mxu1 }
 0x3ad   : > { %v768_v44 = vpop.f32.mrb[15].mxu1  ;;  %v800_v53 = vmul.f32 %v1946_v40, %v1946_v40 }
 0x3ae   : > { %v799_v55 = vmul.f32 %v768_v44, %v768_v44 }
 0x3b0   : > { %v1949_v49 = vpop.f32.mrb[16].mxu1 }
 0x3b1   : > { %v802_v50 = vsub.f32 %v1949_v49, %v798_v45  ;;  %v778_v51 = vpop.f32.mrb[17].mxu1 }
 0x3b2   : > { %v801_v52 = vsub.f32 %v778_v51, %v797_v46 }
 0x3b3   : > { %v806_v54 = vadd.f32 1e-05, %v802_v50 }
 0x3b4   : > { %v805_v56 = vadd.f32 1e-05, %v801_v52  ;;  %v1952_v58 = vpop.f32.mrb[18].mxu1 }
 0x3b5   : > { %2255 = vrsqrt.f32 %v806_v54  ;;  %v804_v59 = vsub.f32 %v1952_v58, %v800_v53  ;;  %v788_v60 = vpop.f32.mrb[19].mxu1 }
 0x3b6   : > { %2257 = vrsqrt.f32 %v805_v56  ;;  %v803_v61 = vsub.f32 %v788_v60, %v799_v55 }
 0x3b7   : > { %v808_v62 = vadd.f32 1e-05, %v804_v59 }
 0x3b8   : > { %v807_v3 = vadd.f32 1e-05, %v803_v61 }
 0x3b9   : > { %2259 = vrsqrt.f32 %v808_v62 }
 0x3ba   : > { %2261 = vrsqrt.f32 %v807_v3 }
 0x3bf   : > { %v2256_v2 = vpop.eup %2255 }
 0x3c0   : > { %v2258_v4 = vpop.eup %2257  ;;  %v830_v9 = vmul.f32 %v2256_v2, %v819_v8 }
 0x3c1   : > { %v829_v5 = vmul.f32 %v2258_v4, %v815_v63 }
 0x3c2   : > { %v834_v6 = vmul.f32 %v1943_v35, %v830_v9  ;;  %v839_v35 = vpop.permute.xlu0 %838 }
 0x3c3   : > { %v2260_v0 = vpop.eup %2259  ;;  %v833_v11 = vmul.f32 %v829_v5, %v758_v38  ;;  %1822 = vmatmul.mubr.msk.f32.vlgmr.msra.gmra.mrb[12].mxu0 %vm857_vm12, %v829_v5  ;;  %v843_v38 = vpop.permute.xlu1 %842 }
 0x3c4   : > { %v2262_v15 = vpop.eup %2261  ;;  %v832_v20 = vmul.f32 %v2260_v0, %v827_v1  ;;  %952 = vmatprep.mubr.f32.mxu0 %v2447_v12  ;;  %1213 = vmatpush1.xpose.msra.mxu0 %v2844_v26 }
 0x3c5   : > { %v831_v21 = vmul.f32 %v2262_v15, %v823_v7  ;;  %v853_v45 = vsub.f32 %v839_v35, %v833_v11 }
 0x3c6   : > { %v836_v22 = vmul.f32 %v1946_v40, %v832_v20  ;;  %v854_v40 = vsub.f32 %v843_v38, %v834_v6  ;;  %v851_v49 = vpop.permute.xlu0 %850 }
 0x3c7   : > { %1823 = vmatmul.mubr.msk.f32.gmra.mrb[14].mxu0 %vm857_vm12, %v830_v9  ;;  %v835_v23 = vmul.f32 %v831_v21, %v768_v44  ;;  %v847_v46 = vpop.permute.xlu1 %846 }
 0x3c8   : > { %958 = vmatprep.mubr.f32.mxu0 %v2447_v12  ;;  %v856_v50 = vsub.f32 %v851_v49, %v836_v22 }
 0x3c9   : > { %v855_v44 = vsub.f32 %v847_v46, %v835_v23 }
 0x3cb   : > { %1824 = vmatmul.mubr.msk.f32.gmra.mrb[16].mxu0 %vm857_vm12, %v831_v21 }
 0x3cc   : > { %964 = vmatprep.mubr.f32.mxu0 %v2447_v12 }
 0x3cf   : > { %1825 = vmatmul.mubr.msk.f32.gmra.mrb[18].mxu0 %vm857_vm12, %v832_v20 }
 0x3d0   : > { %970 = vmatprep.mubr.f32.mxu0 %v2447_v12 }
 0x3d3   : > { %1826 = vmatmul.mubr.msk.f32.gmra.mrb[20].mxu0 %vm857_vm12, %v853_v45 }
 0x3d4   : > { %976 = vmatprep.mubr.f32.mxu0 %v2447_v12 }
 0x3d7   : > { %1827 = vmatmul.mubr.msk.f32.gmra.mrb[22].mxu0 %vm857_vm12, %v854_v40 }
 0x3d8   : > { %982 = vmatprep.mubr.f32.mxu0 %v2447_v12 }
 0x3db   : > { %1828 = vmatmul.mubr.msk.f32.gmra.mrb[24].mxu0 %vm857_vm12, %v855_v44 }
 0x3dc   : > { %988 = vmatprep.mubr.f32.mxu0 %v2447_v12 }
 0x3df   : > { %1829 = vmatmul.mubr.msk.f32.gmra.mrb[26].mxu0 %vm857_vm12, %v856_v50 }
 0x496   : > { %v948_v51 = vpop.f32.mrb[12].mxu0 }
 0x497   : > { %v950_v52 = vpop.f32.mrb[13].mxu0  ;;  %v995_v60 = vmul.f32 %v948_v51, %v2852_v32 }
 0x498   : > { %v996_v61 = vmul.f32 %v950_v52, %v2850_v31 }
 0x49a   : > { %v954_v53 = vpop.f32.mrb[14].mxu0 }
 0x49b   : > { %v956_v54 = vpop.f32.mrb[15].mxu0  ;;  %v997_v8 = vmul.f32 %v954_v53, %v2859_v37 }
 0x49c   : > { %v998_v2 = vmul.f32 %v956_v54, %v2856_v36 }
 0x49e   : > { %v960_v55 = vpop.f32.mrb[16].mxu0 }
 0x49f   : > { %v962_v56 = vpop.f32.mrb[17].mxu0  ;;  %v999_v0 = vmul.f32 %v960_v55, %v2867_v42 }
 0x4a0   : > { %v1000_v32 = vmul.f32 %v962_v56, %v2864_v41 }
 0x4a2   : > { %v966_v58 = vpop.f32.mrb[18].mxu0 }
 0x4a3   : > { %v968_v59 = vpop.f32.mrb[19].mxu0  ;;  %v1001_v45 = vmul.f32 %v966_v58, %v2873_v48 }
 0x4a4   : > { %v1002_v42 = vmul.f32 %v968_v59, %v2871_v47  ;;  %v2451_v47 = vmov 3  }
 0x4a5   : > { %2249 = vset.pattern.permute.xlu1 %v2451_v47  ;;  %2250 = vset.pattern.permute.xlu0 %v2451_v47 }
 0x4a6   : > { %v972_v62 = vpop.f32.mrb[20].mxu0 }
 0x4a7   : > { %v1003_v63 = vadd.f32 %v995_v60, %v972_v62  ;;  %v974_v3 = vpop.f32.mrb[21].mxu0 }
 0x4a8   : > { %v1004_v7 = vadd.f32 %v996_v61, %v974_v3 }
 0x4a9   : > { %v1011_v1 = vmax.f32 %v1003_v63, 0.0 }
 0x4aa   : > { %v978_v4 = vpop.f32.mrb[22].mxu0  ;;  %v1012_v15 = vmax.f32 %v1004_v7, 0.0 }
 0x4ab   : > { %v1005_v9 = vadd.f32 %v997_v8, %v978_v4  ;;  %v980_v5 = vpop.f32.mrb[23].mxu0 }
 0x4ac   : > { %v1006_v6 = vadd.f32 %v998_v2, %v980_v5 }
 0x4ad   : > { %v1013_v11 = vmax.f32 %v1005_v9, 0.0 }
 0x4ae   : > { %v1014_v31 = vmax.f32 %v1006_v6, 0.0  ;;  %v984_v20 = vpop.f32.mrb[24].mxu0 }
 0x4af   : > { %v2956_v21 = vpack.c.bf16 %v1013_v11, %v1011_v1  ;;  %v1007_v22 = vadd.f32 %v999_v0, %v984_v20  ;;  %v986_v23 = vpop.f32.mrb[25].mxu0  ;;  %v2209_v37 = vpack.i.bf16 %v1013_v11, %v1011_v1 }
 0x4b0   : > { %v1008_v35 = vadd.f32 %v1000_v32, %v986_v23  ;;  %v2214_v36 = vpack.i.bf16 %v1014_v31, %v1012_v15  ;;  %v2958_v38 = vpack.c.bf16 %v1014_v31, %v1012_v15 }
 0x4b1   : > { %2210 = vrot.lane.b32.xlu1 %v2209_v37, %s2445_s8  ;;  %v1015_v49 = vmax.f32 %v1007_v22, 0.0 }
 0x4b2   : > { %2215 = vrot.lane.b32.xlu0 %v2214_v36, %s2445_s8  ;;  %v990_v41 = vpop.f32.mrb[26].mxu0  ;;  %v1016_v51 = vmax.f32 %v1008_v35, 0.0 }
 0x4b3   : > { %v1009_v40 = vadd.f32 %v1001_v45, %v990_v41  ;;  %v992_v46 = vpop.f32.mrb[27].mxu0 }
 0x4b4   : > { %v1010_v44 = vadd.f32 %v1002_v42, %v992_v46 }
 0x4b5   : > { %v1017_v50 = vmax.f32 %v1009_v40, 0.0 }
 0x4b6   : > { %v1018_v52 = vmax.f32 %v1010_v44, 0.0 }
 0x4b7   : > { %v2964_v53 = vpack.c.bf16 %v1017_v50, %v1015_v49  ;;  %v2219_v54 = vpack.i.bf16 %v1017_v50, %v1015_v49 }
 0x4b8   : > { %v2224_v55 = vpack.i.bf16 %v1018_v52, %v1016_v51  ;;  %v2045_v56 = vpack.c.bf16 %v1018_v52, %v1016_v51 }
 0x4b9   : > { %2220 = vrot.lane.b32.xlu1 %v2219_v54, %s2445_s8 }
 0x4ba   : > { %2225 = vrot.lane.b32.xlu0 %v2224_v55, %s2445_s8  ;;  %s3125_s8 = scalar_lea.vmem [#allocation8], %s1774_s29 }
 0x4bb   : > { %s1673_s29 = sshll.u32 %s3125_s8, 4  ;;  %s3142_s29 = int_to_ptr.vmem [resolvable:$true] %s1673_s29 }
 0x4bc   : > { %s2365_s7 = scalar_lea.vmem %s3142_s29, 1024  ;;  %p2372_p0 = scmp.lt.s32.totalorder %s3142_s29, %s2370_s30 }
 0x4bd   : > { %2230 = vrot.lane.b32.xlu1 %v2209_v37, %s2446_s11  ;;  %p2366_p3 = scmp.ne.s32.totalorder %s3142_s29, %s2365_s7 }
 0x4be   : > { %2235 = vrot.lane.b32.xlu0 %v2214_v36, %s2446_s11 }
 0x4bf   : > { %p2367_p10 = pnand %p2366_p3, %p3230_p9 }
 0x4c1   : > { %2240 = vrot.lane.b32.xlu1 %v2219_v54, %s2446_s11  ;;  %p2368_p1 = pneg %p2367_p10 }
 0x4c2   : > { %2245 = vrot.lane.b32.xlu0 %v2224_v55, %s2446_s11  ;;  %s1888_s11 = sshll.u32 %s2514_s25, 8  ;;  %s1660_s25 = scalar_lea.sflag [#allocation4], %s2657_s17 }
 0x4c3   : > { %s3149_s20 = scalar_lea.hbm %s3201_s6, %s1888_s11 }
 0x4c5   : > { %1088 = vperm.xlu1 %2249, %v2722_v14  }
 0x4c6   : > { %1092 = vperm.xlu0 %2250, %v2729_v16  }
 0x4c9   : > { %1096 = vperm.xlu1 %2249, %v2717_v13  }
 0x4cd   : > { %1100 = vperm.xlu1 %2249, %v2734_v17  }
 0x523   : > { %v2211_v48 = vpop.permute.xlu1 %2210 }
 0x524   : > { %v2213_v58 = vunpack.i.h.bf16 %v2211_v48  ;;  %v2212_v59 = vunpack.i.l.bf16 %v2211_v48  ;;  %v2216_v60 = vpop.permute.xlu0 %2215 }
 0x525   : > { %v2218_v61 = vunpack.i.h.bf16 %v2216_v60  ;;  %v2217_v62 = vunpack.i.l.bf16 %v2216_v60  ;;  %v1084_v60 = vld [vmem:[#allocation5 + $0x8] sm:$0xff] }
 0x527   : > { %v1035_v63 = vsel %vm370_vm0, %v2212_v59, %v2217_v62  ;;  %v1036_v3 = vsel %vm370_vm0, %v2213_v58, %v2218_v61  ;;  %v1039_v7 = vsel %vm370_vm0, %v2217_v62, %v2212_v59  ;;  %v1040_v8 = vsel %vm370_vm0, %v2218_v61, %v2213_v58 }
 0x528   : > { %v2029_v2 = vpack.c.bf16 %v1036_v3, %v1035_v63  ;;  %v2032_v4 = vpack.c.bf16 %v1040_v8, %v1039_v7 }
 0x52a   : > { %2031 = vmatprep.subr.msk.bf16.mxu1 %vm2751_vm3, %v2029_v2 }
 0x52b   : > { %v2221_v9 = vpop.permute.xlu1 %2220  ;;  %2034 = vmatpush1.bf16.msk.msra.mxu1 %vm2759_vm4, %v2032_v4 }
 0x52c   : > { %v2223_v5 = vunpack.i.h.bf16 %v2221_v9  ;;  %v2222_v6 = vunpack.i.l.bf16 %v2221_v9  ;;  %v2226_v0 = vpop.permute.xlu0 %2225 }
 0x52d   : > { %v2228_v1 = vunpack.i.h.bf16 %v2226_v0  ;;  %v2227_v11 = vunpack.i.l.bf16 %v2226_v0 }
 0x52f   : > { %v1037_v32 = vsel %vm370_vm0, %v2222_v6, %v2227_v11  ;;  %v1038_v15 = vsel %vm370_vm0, %v2223_v5, %v2228_v1  ;;  %v1041_v31 = vsel %vm370_vm0, %v2227_v11, %v2222_v6  ;;  %v1042_v20 = vsel %vm370_vm0, %v2228_v1, %v2223_v5  ;;  %v2231_v22 = vpop.permute.xlu1 %2230 }
 0x530   : > { %v2035_v23 = vpack.c.bf16 %v1038_v15, %v1037_v32  ;;  %v2038_v37 = vpack.c.bf16 %v1042_v20, %v1041_v31  ;;  %v2236_v35 = vpop.permute.xlu0 %2235  ;;  %v2233_v36 = vunpack.i.h.bf16 %v2231_v22  ;;  %v2232_v45 = vunpack.i.l.bf16 %v2231_v22 }
 0x531   : > { %v2238_v42 = vunpack.i.h.bf16 %v2236_v35  ;;  %v2237_v41 = vunpack.i.l.bf16 %v2236_v35 }
 0x532   : > { %2037 = vmatprep.subr.msk.bf16.mxu1 %vm2751_vm3, %v2035_v23 }
 0x533   : > { %2040 = vmatpush1.bf16.msk.msra.mxu1 %vm2759_vm4, %v2038_v37  ;;  %v2241_v40 = vpop.permute.xlu1 %2240  ;;  %v1071_v44 = vsel %vm407_vm5, %v2237_v41, %v2232_v45  ;;  %v1072_v49 = vsel %vm407_vm5, %v2238_v42, %v2233_v36  ;;  %v1067_v39 = vsel %vm407_vm5, %v2232_v45, %v2237_v41  ;;  %v1068_v43 = vsel %vm407_vm5, %v2233_v36, %v2238_v42 }
 0x534   : > { %v2246_v46 = vpop.permute.xlu0 %2245  ;;  %2042 = vmatprep.subr.bf16.mxu1 %v2958_v38  ;;  %v2243_v50 = vunpack.i.h.bf16 %v2241_v40  ;;  %v2242_v51 = vunpack.i.l.bf16 %v2241_v40  ;;  %v2049_v38 = vpack.c.bf16 %v1072_v49, %v1071_v44  ;;  %v2452_v40 = vmov 4  }
 0x535   : > { %v2248_v52 = vunpack.i.h.bf16 %v2246_v46  ;;  %v2247_v54 = vunpack.i.l.bf16 %v2246_v46  ;;  %2252 = vset.pattern.permute.xlu1 %v2452_v40  ;;  %2251 = vset.pattern.permute.xlu0 %v2452_v40  ;;  %v2453_v46 = vmov 5  }
 0x536   : > { %1443 = vperm.xlu1 %2252, %v2729_v16   ;;  %1439 = vperm.xlu0 %2251, %v2722_v14  }
 0x537   : > { %2044 = vmatpush1.bf16.msra.mxu1 %v2956_v21  ;;  %v1073_v55 = vsel %vm407_vm5, %v2247_v54, %v2242_v51  ;;  %v1074_v47 = vsel %vm407_vm5, %v2248_v52, %v2243_v50  ;;  %v2052_v21 = vpack.c.bf16 %v1068_v43, %v1067_v39  ;;  %v1070_v48 = vsel %vm407_vm5, %v2243_v50, %v2248_v52 }
 0x538   : > { %2046 = vmatprep.subr.bf16.mxu1 %v2045_v56  ;;  %v1069_v56 = vsel %vm407_vm5, %v2242_v51, %v2247_v54  ;;  %v2055_v58 = vpack.c.bf16 %v1074_v47, %v1073_v55 }
 0x539   : > { %v2058_v59 = vpack.c.bf16 %v1070_v48, %v1069_v56 }
 0x53a   : > { %1447 = vperm.xlu1 %2252, %v2717_v13   ;;  %1451 = vperm.xlu0 %2251, %v2734_v17  }
 0x53b   : > { %2048 = vmatpush1.bf16.msra.mxu1 %v2964_v53  ;;  %v1083_v53 = vld [vmem:[#allocation5] sm:$0xff] }
 0x53c   : > { %2051 = vmatprep.subr.msk.bf16.mxu1 %vm2796_vm7, %v2049_v38 }
 0x53e   : > { %2253 = vset.pattern.permute.xlu1 %v2453_v46  ;;  %2254 = vset.pattern.permute.xlu0 %v2453_v46 }
 0x53f   : > { %2054 = vmatpush1.bf16.msk.msra.mxu1 %vm2806_vm9, %v2052_v21  ;;  %1463 = vperm.xlu1 %2253, %v2722_v14  }
 0x540   : > { %2057 = vmatprep.subr.msk.bf16.mxu1 %vm2796_vm7, %v2055_v58  ;;  %1467 = vperm.xlu0 %2254, %v2729_v16  }
 0x543   : > { %2060 = vmatpush1.bf16.msk.msra.mxu1 %vm2806_vm9, %v2058_v59  ;;  %1471 = vperm.xlu1 %2253, %v2717_v13  }
 0x544   : > { %v1089_v61 = vpop.permute.xlu1 %1088 }
 0x545   : > { %v1093_v7 = vpop.permute.xlu0 %1092 }
 0x546   : > { %1862 = vmatmul.mubr.msk.f32.vlgmr.msra.gmra.mrb[20].mxu1 %vm452_vm10, %v1083_v53 }
 0x547   : > { %1185 = vmatprep.mubr.f32.mxu1 %v2447_v12  ;;  %1475 = vperm.xlu1 %2253, %v2734_v17  }
 0x548   : > { %v1097_v9 = vpop.permute.xlu1 %1096 }
 0x54a   : > { %1863 = vmatmul.mubr.msk.f32.gmra.mrb[22].mxu1 %vm452_vm10, %v1084_v60 }
 0x54b   : > { %1191 = vmatprep.mubr.f32.mxu1 %v2447_v12 }
 0x54c   : > { %v1101_v32 = vpop.permute.xlu1 %1100 }
 0x54e   : > { %1864 = vmatmul.mubr.msk.f32.gmra.mrb[24].mxu1 %vm452_vm10, %v1085_v19 }
 0x54f   : > { %1197 = vmatprep.mubr.f32.mxu1 %v2447_v12 }
 0x552   : > { %1865 = vmatmul.mubr.msk.f32.gmra.mrb[26].mxu1 %vm452_vm10, %v1086_v10 }
 0x553   : > { %1969 = vmatprep.mubr.msk.f32.mxu1 %vm667_vm11, %v2893_v57 }
 0x619   : > { %v1181_v18 = vpop.f32.mrb[20].mxu1 }
 0x61a   : > { %v1183_v62 = vpop.f32.mrb[21].mxu1  ;;  %v3038_v3 = vadd.f32 %v1181_v18, %v1089_v61 }
 0x61b   : > { %v3036_v63 = vadd.f32 %v1183_v62, %v1089_v61 }
 0x61c   : > { %v1204_v23 = vmul.f32 %v3038_v3, %v3038_v3 }
 0x61d   : > { %v1187_v8 = vpop.f32.mrb[22].mxu1  ;;  %1276 = vmatprep.mubr.f32.mxu0 %v3036_v63  ;;  %v1205_v22 = vmul.f32 %v3036_v63, %v3036_v63 }
 0x61e   : > { %v1189_v2 = vpop.f32.mrb[23].mxu1  ;;  %1277 = vmatmul.mubr.f32.vlgmr.msra.gmra.mrb[28].mxu0 %v3038_v3  ;;  %v3044_v5 = vadd.f32 %v1187_v8, %v1093_v7 }
 0x61f   : > { %v3042_v4 = vadd.f32 %v1189_v2, %v1093_v7 }
 0x620   : > { %v1206_v35 = vmul.f32 %v3044_v5, %v3044_v5 }
 0x621   : > { %v1193_v57 = vpop.f32.mrb[24].mxu1  ;;  %1281 = vmatprep.mubr.f32.mxu0 %v3042_v4  ;;  %v1207_v37 = vmul.f32 %v3042_v4, %v3042_v4 }
 0x622   : > { %v1195_v6 = vpop.f32.mrb[25].mxu1  ;;  %1282 = vmatmul.mubr.f32.gmra.mrb[30].mxu0 %v3044_v5  ;;  %v3050_v1 = vadd.f32 %v1193_v57, %v1097_v9  ;;  %v1440_v57 = vpop.permute.xlu0 %1439 }
 0x623   : > { %v3048_v0 = vadd.f32 %v1195_v6, %v1097_v9  ;;  %v1444_v6 = vpop.permute.xlu1 %1443 }
 0x624   : > { %v1208_v45 = vmul.f32 %v3050_v1, %v3050_v1 }
 0x625   : > { %v1199_v11 = vpop.f32.mrb[26].mxu1  ;;  %1286 = vmatprep.mubr.f32.mxu0 %v3048_v0  ;;  %v1209_v36 = vmul.f32 %v3048_v0, %v3048_v0 }
 0x626   : > { %v1201_v15 = vpop.f32.mrb[27].mxu1  ;;  %1287 = vmatmul.mubr.f32.gmra.mrb[32].mxu0 %v3050_v1  ;;  %v3056_v20 = vadd.f32 %v1199_v11, %v1101_v32 }
 0x627   : > { %v3054_v31 = vadd.f32 %v1201_v15, %v1101_v32 }
 0x628   : > { %v1210_v41 = vmul.f32 %v3056_v20, %v3056_v20 }
 0x629   : > { %1291 = vmatprep.mubr.f32.mxu0 %v3054_v31  ;;  %v1211_v42 = vmul.f32 %v3054_v31, %v3054_v31 }
 0x62a   : > { %1292 = vmatmul.mubr.f32.gmra.mrb[34].mxu0 %v3056_v20 }
 0x62b   : > { %1296 = vmatprep.mubr.f32.mxu0 %v1205_v22 }
 0x62e   : > { %1297 = vmatmul.mubr.f32.gmra.mrb[36].mxu0 %v1204_v23 }
 0x62f   : > { %1301 = vmatprep.mubr.f32.mxu0 %v1207_v37 }
 0x632   : > { %1302 = vmatmul.mubr.f32.gmra.mrb[38].mxu0 %v1206_v35  ;;  %v1452_v35 = vpop.permute.xlu0 %1451 }
 0x633   : > { %1306 = vmatprep.mubr.f32.mxu0 %v1209_v36 }
 0x636   : > { %1307 = vmatmul.mubr.f32.gmra.mrb[40].mxu0 %v1208_v45 }
 0x637   : > { %1311 = vmatprep.mubr.f32.mxu0 %v1211_v42  ;;  %v1448_v42 = vpop.permute.xlu1 %1447 }
 0x63a   : > { %1312 = vmatmul.mubr.f32.gmra.mrb[42].mxu0 %v1210_v41 }
 0x6f1   : > { %v1278_v44 = vpop.f32.mrb[28].mxu0 }
 0x6f2   : > { %v1280_v49 = vpop.f32.mrb[29].mxu0 }
 0x6f3   : > { %v1464_v49 = vpop.permute.xlu1 %1463 }
 0x6f5   : > { %v1283_v50 = vpop.f32.mrb[30].mxu0 }
 0x6f6   : > { %v2061_v51 = vpack.c.bf16 %v1283_v50, %v1278_v44  ;;  %v1285_v52 = vpop.f32.mrb[31].mxu0 }
 0x6f7   : > { %v1472_v52 = vpop.permute.xlu1 %1471 }
 0x6f8   : > { %2062 = vmatprep.subr.bf16.mxu1 %v2061_v51 }
 0x6f9   : > { %v1288_v54 = vpop.f32.mrb[32].mxu0  ;;  %2064 = vmatpush3.bf16.msra.mxu1 %v2061_v51  ;;  %v1468_v51 = vpop.permute.xlu0 %1467 }
 0x6fa   : > { %v1290_v39 = vpop.f32.mrb[33].mxu0 }
 0x6fd   : > { %v1293_v43 = vpop.f32.mrb[34].mxu0 }
 0x6fe   : > { %v2065_v38 = vpack.c.bf16 %v1293_v43, %v1288_v54  ;;  %v1295_v55 = vpop.f32.mrb[35].mxu0  ;;  %v1476_v43 = vpop.permute.xlu1 %1475 }
 0x700   : > { %2066 = vmatprep.subr.bf16.mxu1 %v2065_v38 }
 0x701   : > { %v1298_v14 = vpop.f32.mrb[36].mxu0  ;;  %2068 = vmatpush3.bf16.msra.mxu1 %v2065_v38 }
 0x702   : > { %v1300_v16 = vpop.f32.mrb[37].mxu0 }
 0x705   : > { %v1303_v47 = vpop.f32.mrb[38].mxu0 }
 0x706   : > { %v2069_v13 = vpack.c.bf16 %v1303_v47, %v1298_v14  ;;  %v1305_v21 = vpop.f32.mrb[39].mxu0 }
 0x708   : > { %2070 = vmatprep.subr.bf16.mxu1 %v2069_v13 }
 0x709   : > { %v1308_v17 = vpop.f32.mrb[40].mxu0  ;;  %2072 = vmatpush3.bf16.msra.mxu1 %v2069_v13 }
 0x70a   : > { %v1310_v56 = vpop.f32.mrb[41].mxu0 }
 0x70d   : > { %v1313_v48 = vpop.f32.mrb[42].mxu0 }
 0x70e   : > { %v2073_v58 = vpack.c.bf16 %v1313_v48, %v1308_v17  ;;  %v1315_v59 = vpop.f32.mrb[43].mxu0 }
 0x710   : > { %2074 = vmatprep.subr.bf16.mxu1 %v2073_v58 }
 0x711   : > { %2076 = vmatpush3.bf16.msra.mxu1 %v2073_v58 }
 0x712   : > { %1506 = vmatprep.subr.mxu1 %v2838_v25 }
 0x714   : > { %1970 = vmatmul.mubr.msk.f32.vlgmr.msra.gmra.mrb[28].mxu1 %vm667_vm11, %v2905_v24 }
 0x715   : > { %1972 = vmatprep.mubr.msk.f32.mxu1 %vm667_vm11, %v2907_v27  ;;  %1507 = vmatpush1.msra.mxu1 %v2844_v26 }
 0x718   : > { %1973 = vmatmul.mubr.msk.f32.gmra.mrb[30].mxu1 %vm667_vm11, %v2913_v28 }
 0x719   : > { %1975 = vmatprep.mubr.msk.f32.mxu1 %vm667_vm11, %v2915_v29 }
 0x71c   : > { %1976 = vmatmul.mubr.msk.f32.gmra.mrb[32].mxu1 %vm667_vm11, %v2921_v30 }
 0x71d   : > { %1978 = vmatprep.mubr.msk.f32.mxu1 %vm667_vm11, %v2923_v33 }
 0x720   : > { %1979 = vmatmul.mubr.msk.f32.gmra.mrb[34].mxu1 %vm667_vm11, %v2929_v34 }
 0x721   : > { %1570 = vmatprep.mubr.f32.mxu1 %v2447_v12 }
 0x7e7   : > { %v1971_v25 = vpop.f32.mrb[28].mxu1 }
 0x7e8   : > { %v1383_v24 = vpop.f32.mrb[29].mxu1  ;;  %v1423_v53 = vmul.f32 %v1971_v25, %v1971_v25 }
 0x7e9   : > { %v1422_v28 = vmul.f32 %v1383_v24, %v1383_v24 }
 0x7eb   : > { %v1974_v26 = vpop.f32.mrb[30].mxu1 }
 0x7ec   : > { %v1393_v27 = vpop.f32.mrb[31].mxu1  ;;  %v1425_v18 = vmul.f32 %v1974_v26, %v1974_v26 }
 0x7ed   : > { %v1424_v61 = vmul.f32 %v1393_v27, %v1393_v27 }
 0x7ef   : > { %v1977_v60 = vpop.f32.mrb[32].mxu1 }
 0x7f0   : > { %v1427_v19 = vsub.f32 %v1977_v60, %v1423_v53  ;;  %v1403_v29 = vpop.f32.mrb[33].mxu1  ;;  %v2272_v60 = vld [vmem:[%s2663_s26 + $0x8] sm:$0xff] }
 0x7f1   : > { %v1426_v10 = vsub.f32 %v1403_v29, %v1422_v28 }
 0x7f2   : > { %v1431_v30 = vadd.f32 1e-05, %v1427_v19 }
 0x7f3   : > { %v1430_v62 = vadd.f32 1e-05, %v1426_v10  ;;  %v1980_v33 = vpop.f32.mrb[34].mxu1 }
 0x7f4   : > { %2263 = vrsqrt.f32 %v1431_v30  ;;  %v1429_v7 = vsub.f32 %v1980_v33, %v1425_v18  ;;  %v1413_v34 = vpop.f32.mrb[35].mxu1  ;;  %v2274_v33 = vld [vmem:[%s2663_s26 + $0x18] sm:$0xff] }
 0x7f5   : > { %2265 = vrsqrt.f32 %v1430_v62  ;;  %v1428_v8 = vsub.f32 %v1413_v34, %v1424_v61 }
 0x7f6   : > { %v1433_v2 = vadd.f32 1e-05, %v1429_v7 }
 0x7f7   : > { %v1432_v9 = vadd.f32 1e-05, %v1428_v8 }
 0x7f8   : > { %2267 = vrsqrt.f32 %v1433_v2 }
 0x7f9   : > { %2269 = vrsqrt.f32 %v1432_v9 }
 0x7fe   : > { %v2264_v11 = vpop.eup %2263 }
 0x7ff   : > { %v2266_v32 = vpop.eup %2265  ;;  %v1455_v15 = vmul.f32 %v2264_v11, %v1444_v6  ;;  %v2275_v11 = vld [vmem:[%s2663_s26 + $0x20] sm:$0xff] }
 0x800   : > { %v1454_v22 = vmul.f32 %v2266_v32, %v1440_v57 }
 0x801   : > { %v1459_v23 = vmul.f32 %v1971_v25, %v1455_v15 }
 0x802   : > { %v2268_v37 = vpop.eup %2267  ;;  %v1458_v36 = vmul.f32 %v1454_v22, %v1383_v24  ;;  %1874 = vmatmul.mubr.msk.f32.vlgmr.msra.gmra.mrb[36].mxu1 %vm857_vm12, %v1454_v22 }
 0x803   : > { %v2270_v45 = vpop.eup %2269  ;;  %v1457_v41 = vmul.f32 %v2268_v37, %v1452_v35  ;;  %1576 = vmatprep.mubr.f32.mxu1 %v2447_v12  ;;  %v1479_v54 = vsub.f32 %v1468_v51, %v1459_v23 }
 0x804   : > { %v1456_v40 = vmul.f32 %v2270_v45, %v1448_v42  ;;  %v1478_v50 = vsub.f32 %v1464_v49, %v1458_v36  ;;  %v2277_v42 = vld [vmem:[%s2663_s26 + $0x30] sm:$0xff] }
 0x805   : > { %v1461_v46 = vmul.f32 %v1974_v26, %v1457_v41 }
 0x806   : > { %v1460_v44 = vmul.f32 %v1456_v40, %v1393_v27  ;;  %1875 = vmatmul.mubr.msk.f32.gmra.mrb[38].mxu1 %vm857_vm12, %v1455_v15  ;;  %v2271_v27 = vld [vmem:[%s2663_s26] sm:$0xff]  ;;  %v2276_v15 = vld [vmem:[%s2663_s26 + $0x28] sm:$0xff] }
 0x807   : > { %1582 = vmatprep.mubr.f32.mxu1 %v2447_v12  ;;  %v1481_v38 = vsub.f32 %v1476_v43, %v1461_v46 }
 0x808   : > { %v1480_v39 = vsub.f32 %v1472_v52, %v1460_v44 }
 0x80a   : > { %1876 = vmatmul.mubr.msk.f32.gmra.mrb[40].mxu1 %vm857_vm12, %v1456_v40 }
 0x80b   : > { %1588 = vmatprep.mubr.f32.mxu1 %v2447_v12 }
 0x80e   : > { %1877 = vmatmul.mubr.msk.f32.gmra.mrb[42].mxu1 %vm857_vm12, %v1457_v41  ;;  %v2278_v41 = vld [vmem:[%s2663_s26 + $0x38] sm:$0xff] }
 0x80f   : > { %1594 = vmatprep.mubr.f32.mxu1 %v2447_v12 }
 0x812   : > { %1878 = vmatmul.mubr.msk.f32.gmra.mrb[44].mxu1 %vm857_vm12, %v1478_v50 }
 0x813   : > { %1600 = vmatprep.mubr.f32.mxu1 %v2447_v12 }
 0x816   : > { %1879 = vmatmul.mubr.msk.f32.gmra.mrb[46].mxu1 %vm857_vm12, %v1479_v54 }
 0x817   : > { %1606 = vmatprep.mubr.f32.mxu1 %v2447_v12 }
 0x81a   : > { %1880 = vmatmul.mubr.msk.f32.gmra.mrb[48].mxu1 %vm857_vm12, %v1480_v39 }
 0x81b   : > { %1612 = vmatprep.mubr.f32.mxu1 %v2447_v12 }
 0x81e   : > { %1881 = vmatmul.mubr.msk.f32.gmra.mrb[50].mxu1 %vm857_vm12, %v1481_v38 }
 0x8d5   : > { %v1572_v55 = vpop.f32.mrb[36].mxu1 }
 0x8d6   : > { %v1574_v14 = vpop.f32.mrb[37].mxu1  ;;  %v1619_v48 = vmul.f32 %v1572_v55, %v3038_v3 }
 0x8d7   : > { %v1620_v58 = vmul.f32 %v1574_v14, %v3036_v63 }
 0x8d9   : > { %v1578_v16 = vpop.f32.mrb[38].mxu1 }
 0x8da   : > { %v1580_v47 = vpop.f32.mrb[39].mxu1  ;;  %v1621_v26 = vmul.f32 %v1578_v16, %v3044_v5 }
 0x8db   : > { %v1622_v28 = vmul.f32 %v1580_v47, %v3042_v4  ;;  %v2273_v4 = vld [vmem:[%s2663_s26 + $0x10] sm:$0xff]  ;;  %s2371_s26 = scalar_lea.vmem %s2370_s30, 2048 }
 0x8dc   : > { %p2373_p7 = scmp.lt.s32.totalorder %s2371_s26, %s2365_s7 }
 0x8dd   : > { %v1584_v13 = vpop.f32.mrb[40].mxu1 }
 0x8de   : > { %v1586_v21 = vpop.f32.mrb[41].mxu1  ;;  %v1623_v61 = vmul.f32 %v1584_v13, %v3050_v1  ;;  %p2374_p2 = por %p2373_p7, %p2372_p0 }
 0x8df   : > { %v1624_v62 = vmul.f32 %v1586_v21, %v3048_v0 }
 0x8e0   : > { %p2375_p5 = pnand %p2374_p2, %p2368_p1 }
 0x8e1   : > { %v1590_v17 = vpop.f32.mrb[42].mxu1 }
 0x8e2   : > { %v1592_v56 = vpop.f32.mrb[43].mxu1  ;;  %v1625_v6 = vmul.f32 %v1590_v17, %v3056_v20 }
 0x8e3   : > { %v1626_v0 = vmul.f32 %v1592_v56, %v3054_v31 }
 0x8e5   : > { %v1596_v59 = vpop.f32.mrb[44].mxu1 }
 0x8e6   : > { %v1627_v25 = vadd.f32 %v1619_v48, %v1596_v59  ;;  %v1598_v12 = vpop.f32.mrb[45].mxu1 }
 0x8e7   : > { %v1628_v24 = vadd.f32 %v1620_v58, %v1598_v12 }
 0x8e8   : > { %v1635_v53 = vadd.f32 %v2271_v27, %v1627_v25 }
 0x8e9   : > { %v1636_v19 = vadd.f32 %v2272_v60, %v1628_v24  ;;  %v1602_v29 = vpop.f32.mrb[46].mxu1 }
 0x8ea   : > { %v1643_v10 = vmax.f32 %v1635_v53, 0.0  ;;  %v1629_v3 = vadd.f32 %v1621_v26, %v1602_v29  ;;  %v1604_v18 = vpop.f32.mrb[47].mxu1 }
 0x8eb   : > { %v1644_v63 = vmax.f32 %v1636_v19, 0.0  ;;  %v1630_v30 = vadd.f32 %v1622_v28, %v1604_v18 }
 0x8ec   : > { %1651 = vst [vmem:[%s3125_s8] sm:$0xff] %v1643_v10  ;;  %v1637_v5 = vadd.f32 %v2273_v4, %v1629_v3 }
 0x8ed   : > { %1652 = vst [vmem:[%s3125_s8 + $0x8] sm:$0xff] %v1644_v63  ;;  %v1638_v7 = vadd.f32 %v2274_v33, %v1630_v30  ;;  %v1608_v34 = vpop.f32.mrb[48].mxu1 }
 0x8ee   : > { %v1645_v1 = vmax.f32 %v1637_v5, 0.0  ;;  %v1631_v8 = vadd.f32 %v1623_v61, %v1608_v34  ;;  %v1610_v2 = vpop.f32.mrb[49].mxu1 }
 0x8ef   : > { %v1646_v9 = vmax.f32 %v1638_v7, 0.0  ;;  %v1632_v57 = vadd.f32 %v1624_v62, %v1610_v2 }
 0x8f0   : > { %1653 = vst [vmem:[%s3125_s8 + $0x10] sm:$0xff] %v1645_v1  ;;  %v1639_v32 = vadd.f32 %v2275_v11, %v1631_v8 }
 0x8f1   : > { %1654 = vst [vmem:[%s3125_s8 + $0x18] sm:$0xff] %v1646_v9  ;;  %v1640_v22 = vadd.f32 %v2276_v15, %v1632_v57  ;;  %v1614_v23 = vpop.f32.mrb[50].mxu1 }
 0x8f2   : > { %v1647_v37 = vmax.f32 %v1639_v32, 0.0  ;;  %v1633_v35 = vadd.f32 %v1625_v6, %v1614_v23  ;;  %v1616_v36 = vpop.f32.mrb[51].mxu1 }
 0x8f3   : > { %v1648_v20 = vmax.f32 %v1640_v22, 0.0  ;;  %v1634_v45 = vadd.f32 %v1626_v0, %v1616_v36 }
 0x8f4   : > { %1655 = vst [vmem:[%s3125_s8 + $0x20] sm:$0xff] %v1647_v37  ;;  %v1641_v31 = vadd.f32 %v2277_v42, %v1633_v35 }
 0x8f5   : > { %1656 = vst [vmem:[%s3125_s8 + $0x28] sm:$0xff] %v1648_v20  ;;  %v1642_v40 = vadd.f32 %v2278_v41, %v1634_v45 }
 0x8f6   : > { %v1649_v46 = vmax.f32 %v1641_v31, 0.0 }
 0x8f7   : > { %v1650_v44 = vmax.f32 %v1642_v40, 0.0 }
 0x8f8   : > { %1657 = vst [vmem:[%s3125_s8 + $0x30] sm:$0xff] %v1649_v46 }
 0x8f9   : > { %1658 = vst [vmem:[%s3125_s8 + $0x38] sm:$0xff] %v1650_v44 }
 0x8fa   : > { %2378 = shalt.err (!%p2375_p5)
}
 0x8fb   : > { %s2379_s28 = scalar_lea.hbm %s3149_s20, 1024  ;;  %s2383_s19 = scalar_lea.hbm %s3201_s6, 2048 }
 0x8fc   : > { %p2380_p11 = scmp.ne.s32.totalorder %s3149_s20, %s2379_s28  ;;  %p2384_p6 = scmp.lt.u32.totalorder %s3149_s20, %s3201_s6 }
 0x8fd   : > { %p2385_p8 = scmp.lt.u32.totalorder %s2383_s19, %s2379_s28  ;;  %p2387_p3 = scmp.lt.u32.totalorder %s2379_s28, %s3149_s20 }
 0x8fe   : > { %p2381_p12 = pnand %p2380_p11, %p3230_p9 }
 0x8ff   : > { %p2386_p13 = por %p2385_p8, %p2384_p6 }
 0x900   : > { %p2382_p4 = pneg %p2381_p12 }
 0x901   : > { %p2388_p10 = por %p2387_p3, %p2386_p13 }
 0x903   : > { %p2389_p1 = pnand %p2388_p10, %p2382_p4 }
 0x905   : > { %2392 = shalt.err (!%p2389_p1)
}
 0x906   : > { %s2455_s11 = smov 256   ;;  %s2456_s15 = smov 512  }
 0x907   : > { %s2457_s12 = smov 16  }
 0x908   : > { %2089 = dma.vmem_to_hbm [thread:$0]  (%p3230_p9), %s3142_s29, 1024, %s3149_s20, %s1660_s25, %s2455_s11, %s2456_s15, %s2457_s12  }
 0x909 PF: > { %s1688_s7 = sand.u32 1, %s2423_s21   ;;  %p3231_p0 = scmp.ne.s32.totalorder %s3211_s10, 0 }
 0x90a   : > { %p3232_p7 = scmp.ge.s32.totalorder %s2435_s24, 2  ;;  %s1689_s18 = scalar_lea.sflag [#allocation4], %s1688_s7 }
 0x90c   : > { %p2103_p2 = pnand %p3232_p7, %p3231_p0 }
 0x90e   : > { %2418 = dma.done.wait (!%p2103_p2), %s1689_s18, 1024  }
 0x90f   : > { %2420 = vsyncadd (!%p2103_p2), %s1689_s18, 4294966272  ;;  %s3233_s30 = sld [smem:[#allocation12_spill]]  ;;  %p20_p5 = scmp.ge.s32.totalorder %s2518_s27, 4  }
 0x910   : > { %s3234_s21 = smov %s2427_s22  ;;  %s3235_s22 = smov %s2431_s23 }
 0x911   : > { %s3237_s24 = smov %s2518_s27  ;;  %22 = sbr.rel (!%p20_p5) target bundleno = 6 (0x6), region = 97 }
 0x915   : > { %s3236_s23 = smov %s3233_s30 }
 0x918   :  { %1694 = vsyncpa [#allocation3], 1 }
 0x919   :  { %1696 = vsyncpa [#allocation3 + $0x1], 1 }
 0x91a   :  { %1697 = vsyncpa [#allocation6], 1 }
 0x91b   :  { %1698 = vsyncpa [#allocation4], 1 }
 0x91c   :  { %1700 = vsyncpa [#allocation4 + $0x1], 1 }

</bundles_post_ra>
